<compile_context>
chip_gen: v6e
topology: v6e:2x2x1
jax: 0.10.0
libtpu: 0.0.40
codegen_flags: <defaults>
</compile_context>

<pallas_src>
import functools

import numpy as np
import jax
import jax.numpy as jnp
from jax import lax
from jax.experimental import pallas as pl
from jax.experimental.pallas import tpu as pltpu


# ----------------------------------------------------------------------------------
# Parameter-setup glue (tiny, runs once at __init__): exp_so3 on (N,3) orientations.
# ----------------------------------------------------------------------------------
def exp_so3_np(phi):
    theta = np.maximum(np.linalg.norm(phi, axis=-1, keepdims=True), 1e-12)
    n = phi / theta
    nnT = np.einsum('...i,...j->...ij', n, n)
    n_star = np.zeros_like(nnT)
    n_star[..., 0, 1] = -n[..., 2]
    n_star[..., 0, 2] = n[..., 1]
    n_star[..., 1, 0] = n[..., 2]
    n_star[..., 1, 2] = -n[..., 0]
    n_star[..., 2, 0] = -n[..., 1]
    n_star[..., 2, 1] = n[..., 0]
    I = np.broadcast_to(np.eye(3, dtype=np.float64), nnT.shape)
    th = theta[..., None]
    R = np.cos(th) * I + (1.0 - np.cos(th)) * nnT + np.sin(th) * n_star
    residual = np.einsum('...ij,...kj->...ik', R, R) - I
    assert (np.linalg.norm(residual, axis=(-2, -1)) < 1e-6).all()
    return R.astype(np.float32)


def _grid1_sample_matrix_np(H, W):
    """Static (P_src, P_sample) bilinear weight matrix for sampling at grid1.

    Reproduces: normalize by (W-1)/(H-1), grid_sample(align_corners=False,
    padding_mode='border') at the pixel-center grid.  grid1 never changes, so
    this is built once on the host instead of on the VPU every forward().
    """
    P = H * W
    u = np.tile(np.arange(W, dtype=np.float64) + 0.5, H)
    v = np.repeat(np.arange(H, dtype=np.float64) + 0.5, W)
    ix = np.clip(u * (W / (W - 1.0)) - 0.5, 0.0, W - 1.0)
    iy = np.clip(v * (H / (H - 1.0)) - 0.5, 0.0, H - 1.0)
    x0 = np.floor(ix)
    y0 = np.floor(iy)
    wx = ix - x0
    wy = iy - y0
    x0i = x0.astype(np.int64)
    y0i = y0.astype(np.int64)
    x1i = np.minimum(x0i + 1, W - 1)
    y1i = np.minimum(y0i + 1, H - 1)
    M = np.zeros((P, P), np.float64)
    cols = np.arange(P)
    np.add.at(M, (y0i * W + x0i, cols), (1.0 - wx) * (1.0 - wy))
    np.add.at(M, (y0i * W + x1i, cols), wx * (1.0 - wy))
    np.add.at(M, (y1i * W + x0i, cols), (1.0 - wx) * wy)
    np.add.at(M, (y1i * W + x1i, cols), wx * wy)
    return M.astype(np.float32)


# ----------------------------------------------------------------------------------
# Single fused kernel.
#   inputs : flow (2, n_pairs, P) VMEM, grid (2, P) VMEM, w1t (P, P) VMEM,
#            pose (24, n_pairs, 1) VMEM, cam (8,) SMEM
#   outputs: loss (1,1), depths (N, P), points planar (3N, P)  [X | Y | Z blocks]
# ----------------------------------------------------------------------------------
def _fused_flowmap_kernel(flow_ref, grid_ref, w1t_ref, pose_ref, cam_ref,
                          loss_ref, depths_ref, points_ref,
                          *, pairs, n_images, H, W):
    P = H * W
    n_pairs = len(pairs)
    N = n_images
    f32 = jnp.float32

    fx = cam_ref[0]
    fy = cam_ref[1]
    cx = cam_ref[2]
    cy = cam_ref[3]
    k1 = cam_ref[4]
    k2 = cam_ref[5]
    p1d = cam_ref[6]
    p2d = cam_ref[7]
    inv_fx = 1.0 / fx
    inv_fy = 1.0 / fy

    gx = grid_ref[0:1, :]            # (1, P) pixel-center x (shared by all pairs)
    gy = grid_ref[1:2, :]            # (1, P) pixel-center y
    x1 = (gx - cx) * inv_fx
    y1 = (gy - cy) * inv_fy

    # ---------------- Stage 1: triangulation, vectorized over pairs (sublane dim)
    du = flow_ref[0]                 # (n_pairs, P)
    dv = flow_ref[1]
    u2 = gx + du                     # (n_pairs, P)  -- kept live, reused in Stage 4
    v2 = gy + dv
    x2 = (u2 - cx) * inv_fx
    y2 = (v2 - cy) * inv_fy

    def pcol(c):                     # (n_pairs, 1) pose column, broadcasts over lanes
        return pose_ref[c]

    r1 = [pcol(c) for c in range(9)]         # R1 row-major
    t1 = [pcol(9 + c) for c in range(3)]
    r2 = [pcol(12 + c) for c in range(9)]    # R2 row-major
    t2 = [pcol(21 + c) for c in range(3)]

    row_defs = [
        ([x1 * r1[6 + c] - r1[c] for c in range(3)],     t1[0] - x1 * t1[2]),
        ([y1 * r1[6 + c] - r1[3 + c] for c in range(3)], t1[1] - y1 * t1[2]),
        ([x2 * r2[6 + c] - r2[c] for c in range(3)],     t2[0] - x2 * t2[2]),
        ([y2 * r2[6 + c] - r2[3 + c] for c in range(3)], t2[1] - y2 * t2[2]),
    ]
    acc = None
    for rc, bv in row_defs:          # accumulate A^T A (symmetric) and A^T b
        terms = (rc[0] * rc[0], rc[0] * rc[1], rc[0] * rc[2],
                 rc[1] * rc[1], rc[1] * rc[2], rc[2] * rc[2],
                 rc[0] * bv, rc[1] * bv, rc[2] * bv)
        acc = terms if acc is None else tuple(s + t for s, t in zip(acc, terms))
    a, b, c, d, e, f, B0, B1, B2 = acc

    det = a * (d * f - e * e) - b * (b * f - c * e) + c * (b * e - c * d)
    rcp = pl.reciprocal(det, approx=True)          # EUP slot (nearly free)
    inv_det = rcp * (2.0 - det * rcp)              # one Newton step -> ~f32 exact
    i00 = d * f - e * e
    i01 = c * e - b * f
    i02 = b * e - c * d
    i11 = a * f - c * c
    i12 = b * c - a * e
    i22 = a * d - b * b
    px = (i00 * B0 + i01 * B1 + i02 * B2) * inv_det
    py = (i01 * B0 + i11 * B1 + i12 * B2) * inv_det
    pz = (i02 * B0 + i12 * B1 + i22 * B2) * inv_det

    # depth = (points @ R + t)[..., 2]  ->  third *column* of R.
    d1 = px * r1[2] + py * r1[5] + pz * r1[8] + t1[2]      # (n_pairs, P)
    d2 = px * r2[2] + py * r2[5] + pz * r2[8] + t2[2]

    # negative-depth penalty: ratio of sums == ratio of means (1/P cancels).
    mr1 = jnp.sum(jnp.maximum(-d1, 0.0), axis=-1, keepdims=True)
    ma1 = jnp.sum(jnp.abs(d1), axis=-1, keepdims=True)
    mr2 = jnp.sum(jnp.maximum(-d2, 0.0), axis=-1, keepdims=True)
    ma2 = jnp.sum(jnp.abs(d2), axis=-1, keepdims=True)
    neg_pen = jnp.sum(mr1 / ma1 + mr2 / ma2, axis=0, keepdims=True)   # (1, 1)

    # ---------------- Stage 2: per-image mean depth + depth-consistency loss
    depth_all = jnp.concatenate([d1, d2], axis=0)        # (2*n_pairs, P)
    row_img = [i for (i, _j) in pairs] + [j for (_i, j) in pairs]
    img_rows = [[r for r, im in enumerate(row_img) if im == idx] for idx in range(N)]

    mean_rows = []
    for idx in range(N):
        rs = img_rows[idx]
        s = depth_all[rs[0]:rs[0] + 1, :]
        for r in rs[1:]:
            s = s + depth_all[r:r + 1, :]
        mean_rows.append(s * (1.0 / float(len(rs))))
    mean_img = jnp.concatenate(mean_rows, axis=0)        # (N, P)

    mean_per_row = jnp.concatenate(
        [mean_rows[row_img[r]] for r in range(2 * n_pairs)], axis=0)   # (2*n_pairs, P)
    row_abs = jnp.sum(jnp.abs(mean_per_row - depth_all), axis=-1, keepdims=True)
    mean_abs = jnp.sum(jnp.abs(mean_img), axis=-1, keepdims=True)      # (N, 1)

    consist_loss = jnp.zeros((1, 1), f32)
    for idx in range(N):
        rs = img_rows[idx]
        s = row_abs[rs[0]:rs[0] + 1, :]
        for r in rs[1:]:
            s = s + row_abs[r:r + 1, :]
        # consist/scale == abs_sum / (k^2 * sum|mean_i|)
        consist_loss = consist_loss + s / (mean_abs[idx:idx + 1, :] *
                                           float(len(rs) * len(rs)))

    # ---------------- Stage 3: global depth normalization + unprojection (N, P)
    total = jnp.sum(jnp.sum(mean_img, axis=-1, keepdims=True), axis=0, keepdims=True)
    inv_mean_all = float(N * P) / total                   # 1 / mean(depths)
    dnorm = mean_img * inv_mean_all                       # (N, P)

    r2v = x1 * x1 + y1 * y1
    dist = 1.0 + k1 * r2v + k2 * r2v * r2v
    xd = x1 * dist + 2.0 * p1d * x1 * y1 + p2d * (r2v + 2.0 * x1 * x1)
    yd = y1 * dist + 2.0 * p2d * x1 * y1 + p1d * (r2v + 2.0 * y1 * y1)
    X = xd * dnorm                                        # (N, P)
    Y = yd * dnorm

    depths_ref[...] = dnorm                               # one bulk store
    planar = jnp.concatenate([X, Y, dnorm], axis=0)       # (3N, P) planar layout
    points_ref[...] = planar                              # one bulk store

    # ---------------- Stage 4: flow_difference — grid_sample as one-hot MXU matmul
    sx = float(W) / (W - 1.0)
    sy = float(H) / (H - 1.0)
    wi = lax.broadcasted_iota(jnp.int32, (W, P), 0)
    hi = lax.broadcasted_iota(jnp.int32, (H, P), 0)

    def sample_matrix(u, v):
        # u, v: (1, P) pixel-center sample coords.  Separable bilinear weights:
        # (H, P) y-weights and (W, P) x-weights, assembled into the (P_src, P)
        # matrix row-block by row-block (W-aligned sublane blocks).
        ix = jnp.clip(u * sx - 0.5, 0.0, W - 1.0)
        iy = jnp.clip(v * sy - 0.5, 0.0, H - 1.0)
        ix0 = jnp.floor(ix)
        iy0 = jnp.floor(iy)
        wx = ix - ix0
        wy = iy - iy0
        ix0i = ix0.astype(jnp.int32)
        iy0i = iy0.astype(jnp.int32)
        ix1i = jnp.minimum(ix0i + 1, W - 1)
        iy1i = jnp.minimum(iy0i + 1, H - 1)
        wxm = (jnp.where(wi == ix0i, 1.0 - wx, 0.0)
               + jnp.where(wi == ix1i, wx, 0.0))          # (W, P)
        wym = (jnp.where(hi == iy0i, 1.0 - wy, 0.0)
               + jnp.where(hi == iy1i, wy, 0.0))          # (H, P)
        # TODO(synk): for very large H this unrolled concat should become a
        # fori_loop writing (W, P) row-blocks into a (P, P) VMEM scratch.
        return jnp.concatenate([wym[h:h + 1, :] * wxm for h in range(H)],
                               axis=0)                    # (P_src, P_sample)

    # grid1 is static -> its matrix was precomputed on the host; sample every
    # image's 3 channels with ONE batched MXU matmul.
    pad1 = (-3 * N) % 8
    lhs1 = planar if pad1 == 0 else jnp.concatenate(
        [planar, jnp.zeros((pad1, P), f32)], axis=0)
    s1_all = jnp.dot(lhs1, w1t_ref[...], preferred_element_type=f32)   # (3N+pad, P)

    zero_pad2 = jnp.zeros((5, P), f32)
    rms_sum = jnp.zeros((1, 1), f32)
    inv_3p = 1.0 / (3.0 * float(P))
    # TODO(synk): for large n_pairs, move this loop to a parallel grid axis so
    # v7x's second TensorCore is used and vreg liveness stays bounded.
    for k, (i, j) in enumerate(pairs):
        w2t = sample_matrix(u2[k:k + 1, :], v2[k:k + 1, :])
        lhs2 = jnp.concatenate([X[j:j + 1, :], Y[j:j + 1, :], dnorm[j:j + 1, :],
                                zero_pad2], axis=0)       # (8, P)
        s2 = jnp.dot(lhs2, w2t, preferred_element_type=f32)             # (8, P)
        dx = s2[0:1, :] - s1_all[i:i + 1, :]
        dy = s2[1:2, :] - s1_all[N + i:N + i + 1, :]
        dz = s2[2:3, :] - s1_all[2 * N + i:2 * N + i + 1, :]
        ssq = jnp.sum(dx * dx + dy * dy + dz * dz, axis=-1, keepdims=True)
        rms_sum = rms_sum + jnp.sqrt(ssq * inv_3p)

    loss_ref[...] = (rms_sum + neg_pen + consist_loss) * (1.0 / float(n_pairs))


# ----------------------------------------------------------------------------------
# Model (forward pass of mapping/flowmap/flowmap_03.py).
# ----------------------------------------------------------------------------------
class Model:
    def __init__(self, images):
        self.n_images = len(images)
        assert self.n_images > 0, 'Empty image list'
        self.raw_height, self.raw_width = images[0].shape[0], images[0].shape[1]
        assert self.raw_width > 1 and self.raw_height > 1, 'Empty image'
        for img in images:
            assert img.shape == images[0].shape, 'Different image shapes'
        # depth_preprocess only rescales/permutes; spatial size is unchanged.
        self.height, self.width = self.raw_height, self.raw_width
        H, W = self.height, self.width
        P = H * W

        self.positions = np.zeros((self.n_images, 3), np.float32)
        self.orientations = np.zeros((self.n_images, 3), np.float32)
        for i in range(self.n_images):
            self.positions[i, 0] = i
            self.orientations[i, 2] = 0.0 * i
        f = 0.6 * np.sqrt(W * H)
        self.camera_f_rel = np.array([f / W, f / H], np.float32)
        self.camera_c_rel = np.array([0.5, 0.5], np.float32)
        self.camera_dist = np.zeros(4, np.float32)

        # ---- hoisted constant device state (transferred once) ----
        self.R_all = exp_so3_np(self.orientations)        # (N, 3, 3)
        self.t_all = self.positions                       # (N, 3)
        fx, fy = float(self.camera_f[0]), float(self.camera_f[1])
        cx, cy = float(self.camera_c[0]), float(self.camera_c[1])
        grid_x = np.tile(np.arange(W, dtype=np.float32) + 0.5, H)          # (P,)
        grid_y = np.repeat(np.arange(H, dtype=np.float32) + 0.5, W)        # (P,)
        self._grid = jnp.asarray(np.stack([grid_x, grid_y], axis=0))       # (2, P)
        self._w1t = jnp.asarray(_grid1_sample_matrix_np(H, W))             # (P, P)
        self._cam = jnp.asarray(np.array(
            [fx, fy, cx, cy,
             float(self.camera_dist[0]), float(self.camera_dist[1]),
             float(self.camera_dist[2]), float(self.camera_dist[3])], np.float32))
        self._kernel_cache = {}

    @property
    def camera_f(self):
        return self.camera_f_rel * np.array([self.width, self.height], np.float32)

    @property
    def camera_c(self):
        return self.camera_c_rel * np.array([self.width, self.height], np.float32)

    def _get_fused_fn(self, pairs):
        fn = self._kernel_cache.get(pairs)
        if fn is not None:
            return fn
        H, W = self.height, self.width
        P = H * W
        N = self.n_images
        kernel = functools.partial(_fused_flowmap_kernel, pairs=pairs,
                                   n_images=N, H=H, W=W)
        # TODO(synk): for large images the (P, P) sample matrices exceed the
        # v7x/v5e scoped-VMEM budget; the sample (column) dimension would need
        # a grid axis.  32 MiB is plenty for the demo sizes on all generations.
        vmem_limit = 32 * 1024 * 1024
        call = pl.pallas_call(
            kernel,
            out_shape=[jax.ShapeDtypeStruct((1, 1), jnp.float32),      # loss
                       jax.ShapeDtypeStruct((N, P), jnp.float32),      # depths
                       jax.ShapeDtypeStruct((3 * N, P), jnp.float32)], # points (X|Y|Z)
            in_specs=[pl.BlockSpec(memory_space=pltpu.MemorySpace.VMEM),   # flow
                      pl.BlockSpec(memory_space=pltpu.MemorySpace.VMEM),   # grid
                      pl.BlockSpec(memory_space=pltpu.MemorySpace.VMEM),   # w1t
                      pl.BlockSpec(memory_space=pltpu.MemorySpace.VMEM),   # pose
                      pl.BlockSpec(memory_space=pltpu.MemorySpace.SMEM)],  # cam (1-D)
            out_specs=[pl.BlockSpec(memory_space=pltpu.MemorySpace.VMEM)] * 3,
            compiler_params=pltpu.CompilerParams(vmem_limit_bytes=vmem_limit),
        )
        fn = jax.jit(call)
        self._kernel_cache[pairs] = fn
        return fn

    def forward(self, flows, returnv='loss'):
        # flows: {(i, j): (flow (2,H,W) f32, mask (H,W) bool)}
        # TODO(synk): torch.masked_select with a dynamic mask has no static-shape TPU
        # equivalent; the mask is assumed all-True.
        H, W = self.height, self.width
        P = H * W
        pairs = tuple(flows.keys())
        n_pairs = len(pairs)
        assert n_pairs > 0, 'Empty flow dict'
        covered = {i for p in pairs for i in p}
        assert covered == set(range(self.n_images)), \
            'Every image must appear in at least one flow pair'

        # (2, n_pairs, P): du / dv stacks (pairs live in the sublane dim in-kernel).
        flow_arr = jnp.stack(
            [jnp.reshape(flows[p][0], (2, P)) for p in pairs], axis=1)

        pose_np = np.zeros((24, n_pairs, 1), np.float32)
        for k, (i, j) in enumerate(pairs):
            pose_np[0:9, k, 0] = self.R_all[i].reshape(-1)
            pose_np[9:12, k, 0] = self.t_all[i]
            pose_np[12:21, k, 0] = self.R_all[j].reshape(-1)
            pose_np[21:24, k, 0] = self.t_all[j]

        fn = self._get_fused_fn(pairs)
        loss, depths, points = fn(flow_arr, self._grid, self._w1t,
                                  jnp.asarray(pose_np), self._cam)

        if returnv == 'depths':
            return depths.reshape(self.n_images, H, W)
        if returnv == 'points':
            # planar (3N, P) -> (N, H, W, 3)
            return jnp.transpose(points.reshape(3, self.n_images, H, W),
                                 (1, 2, 3, 0))
        if returnv == 'loss':
            return loss[0, 0]
        # TODO(synk): returnv='poses' (SVD-based Procrustes) not implemented in Pallas.
        raise NotImplementedError("returnv='poses' is not supported")


if __name__ == "__main__":
    H, W, N_IMAGES = 8, 16, 3
    images = [np.zeros((H, W, 3), dtype=np.uint8) for _ in range(N_IMAGES)]
    model = Model(images)

    key = jax.random.PRNGKey(0)
    flows = {}
    for i in range(N_IMAGES - 1):
        key, k1 = jax.random.split(key)
        flow = jax.random.normal(k1, (2, H, W), dtype=jnp.float32) * 1.5
        mask = jnp.ones((H, W), dtype=bool)
        flows[(i, i + 1)] = (flow, mask)

    loss = model.forward(flows, returnv='loss')
    loss = jax.block_until_ready(loss)
    _ = float(loss)  # materialize scalar
    print("KERNEL_OK")
</pallas_src>

<mosaic_0001>
module attributes {stable_mosaic.version = 11 : i64} {
  func.func @_fused_flowmap_kernel(%arg0: memref<2x2x128xf32, #tpu.memory_space<vmem>>, %arg1: memref<2x128xf32, #tpu.memory_space<vmem>>, %arg2: memref<128x128xf32, #tpu.memory_space<vmem>>, %arg3: memref<24x2x1xf32, #tpu.memory_space<vmem>>, %arg4: memref<8xf32, #tpu.memory_space<smem>>, %arg5: memref<1x1xf32, #tpu.memory_space<vmem>>, %arg6: memref<3x128xf32, #tpu.memory_space<vmem>>, %arg7: memref<9x128xf32, #tpu.memory_space<vmem>>) attributes {dimension_semantics = [], scalar_prefetch = 0 : i64, scratch_operands = 0 : i64, tpu.core_type = #tpu.core_type<tc>} {
    %c0 = arith.constant 0 : index
    %0 = memref.load %arg4[%c0] : memref<8xf32, #tpu.memory_space<smem>>
    %c1 = arith.constant 1 : index
    %1 = memref.load %arg4[%c1] : memref<8xf32, #tpu.memory_space<smem>>
    %c2 = arith.constant 2 : index
    %2 = memref.load %arg4[%c2] : memref<8xf32, #tpu.memory_space<smem>>
    %c3 = arith.constant 3 : index
    %3 = memref.load %arg4[%c3] : memref<8xf32, #tpu.memory_space<smem>>
    %c4 = arith.constant 4 : index
    %4 = memref.load %arg4[%c4] : memref<8xf32, #tpu.memory_space<smem>>
    %c5 = arith.constant 5 : index
    %5 = memref.load %arg4[%c5] : memref<8xf32, #tpu.memory_space<smem>>
    %c6 = arith.constant 6 : index
    %6 = memref.load %arg4[%c6] : memref<8xf32, #tpu.memory_space<smem>>
    %c7 = arith.constant 7 : index
    %7 = memref.load %arg4[%c7] : memref<8xf32, #tpu.memory_space<smem>>
    %cst = arith.constant 1.000000e+00 : f32
    %8 = arith.divf %cst, %0 : f32
    %cst_0 = arith.constant 1.000000e+00 : f32
    %9 = arith.divf %cst_0, %1 : f32
    %c0_1 = arith.constant 0 : index
    %c0_2 = arith.constant 0 : index
    %10 = vector.load %arg1[%c0_1, %c0_2] : memref<2x128xf32, #tpu.memory_space<vmem>>, vector<1x128xf32>
    %c1_3 = arith.constant 1 : index
    %c0_4 = arith.constant 0 : index
    %11 = vector.load %arg1[%c1_3, %c0_4] : memref<2x128xf32, #tpu.memory_space<vmem>>, vector<1x128xf32>
    %12 = vector.broadcast %2 : f32 to vector<1x128xf32>
    %13 = arith.subf %10, %12 : vector<1x128xf32>
    %14 = vector.broadcast %8 : f32 to vector<1x128xf32>
    %15 = arith.mulf %13, %14 : vector<1x128xf32>
    %16 = vector.broadcast %3 : f32 to vector<1x128xf32>
    %17 = arith.subf %11, %16 : vector<1x128xf32>
    %18 = vector.broadcast %9 : f32 to vector<1x128xf32>
    %19 = arith.mulf %17, %18 : vector<1x128xf32>
    %c0_5 = arith.constant 0 : index
    %c0_6 = arith.constant 0 : index
    %c0_7 = arith.constant 0 : index
    %20 = vector.load %arg0[%c0_5, %c0_6, %c0_7] : memref<2x2x128xf32, #tpu.memory_space<vmem>>, vector<1x2x128xf32>
    %21 = vector.shape_cast %20 : vector<1x2x128xf32> to vector<2x128xf32>
    %c1_8 = arith.constant 1 : index
    %c0_9 = arith.constant 0 : index
    %c0_10 = arith.constant 0 : index
    %22 = vector.load %arg0[%c1_8, %c0_9, %c0_10] : memref<2x2x128xf32, #tpu.memory_space<vmem>>, vector<1x2x128xf32>
    %23 = vector.shape_cast %22 : vector<1x2x128xf32> to vector<2x128xf32>
    %24 = vector.broadcast %10 : vector<1x128xf32> to vector<2x128xf32>
    %25 = arith.addf %24, %21 : vector<2x128xf32>
    %26 = vector.broadcast %11 : vector<1x128xf32> to vector<2x128xf32>
    %27 = arith.addf %26, %23 : vector<2x128xf32>
    %28 = vector.broadcast %2 : f32 to vector<2x128xf32>
    %29 = arith.subf %25, %28 : vector<2x128xf32>
    %30 = vector.broadcast %8 : f32 to vector<2x128xf32>
    %31 = arith.mulf %29, %30 : vector<2x128xf32>
    %32 = vector.broadcast %3 : f32 to vector<2x128xf32>
    %33 = arith.subf %27, %32 : vector<2x128xf32>
    %34 = vector.broadcast %9 : f32 to vector<2x128xf32>
    %35 = arith.mulf %33, %34 : vector<2x128xf32>
    %c0_11 = arith.constant 0 : index
    %c0_12 = arith.constant 0 : index
    %c0_13 = arith.constant 0 : index
    %36 = vector.load %arg3[%c0_11, %c0_12, %c0_13] : memref<24x2x1xf32, #tpu.memory_space<vmem>>, vector<1x2x1xf32>
    %37 = vector.shape_cast %36 : vector<1x2x1xf32> to vector<2x1xf32>
    %c1_14 = arith.constant 1 : index
    %c0_15 = arith.constant 0 : index
    %c0_16 = arith.constant 0 : index
    %38 = vector.load %arg3[%c1_14, %c0_15, %c0_16] : memref<24x2x1xf32, #tpu.memory_space<vmem>>, vector<1x2x1xf32>
    %39 = vector.shape_cast %38 : vector<1x2x1xf32> to vector<2x1xf32>
    %c2_17 = arith.constant 2 : index
    %c0_18 = arith.constant 0 : index
    %c0_19 = arith.constant 0 : index
    %40 = vector.load %arg3[%c2_17, %c0_18, %c0_19] : memref<24x2x1xf32, #tpu.memory_space<vmem>>, vector<1x2x1xf32>
    %41 = vector.shape_cast %40 : vector<1x2x1xf32> to vector<2x1xf32>
    %c3_20 = arith.constant 3 : index
    %c0_21 = arith.constant 0 : index
    %c0_22 = arith.constant 0 : index
    %42 = vector.load %arg3[%c3_20, %c0_21, %c0_22] : memref<24x2x1xf32, #tpu.memory_space<vmem>>, vector<1x2x1xf32>
    %43 = vector.shape_cast %42 : vector<1x2x1xf32> to vector<2x1xf32>
    %c4_23 = arith.constant 4 : index
    %c0_24 = arith.constant 0 : index
    %c0_25 = arith.constant 0 : index
    %44 = vector.load %arg3[%c4_23, %c0_24, %c0_25] : memref<24x2x1xf32, #tpu.memory_space<vmem>>, vector<1x2x1xf32>
    %45 = vector.shape_cast %44 : vector<1x2x1xf32> to vector<2x1xf32>
    %c5_26 = arith.constant 5 : index
    %c0_27 = arith.constant 0 : index
    %c0_28 = arith.constant 0 : index
    %46 = vector.load %arg3[%c5_26, %c0_27, %c0_28] : memref<24x2x1xf32, #tpu.memory_space<vmem>>, vector<1x2x1xf32>
    %47 = vector.shape_cast %46 : vector<1x2x1xf32> to vector<2x1xf32>
    %c6_29 = arith.constant 6 : index
    %c0_30 = arith.constant 0 : index
    %c0_31 = arith.constant 0 : index
    %48 = vector.load %arg3[%c6_29, %c0_30, %c0_31] : memref<24x2x1xf32, #tpu.memory_space<vmem>>, vector<1x2x1xf32>
    %49 = vector.shape_cast %48 : vector<1x2x1xf32> to vector<2x1xf32>
    %c7_32 = arith.constant 7 : index
    %c0_33 = arith.constant 0 : index
    %c0_34 = arith.constant 0 : index
    %50 = vector.load %arg3[%c7_32, %c0_33, %c0_34] : memref<24x2x1xf32, #tpu.memory_space<vmem>>, vector<1x2x1xf32>
    %51 = vector.shape_cast %50 : vector<1x2x1xf32> to vector<2x1xf32>
    %c8 = arith.constant 8 : index
    %c0_35 = arith.constant 0 : index
    %c0_36 = arith.constant 0 : index
    %52 = vector.load %arg3[%c8, %c0_35, %c0_36] : memref<24x2x1xf32, #tpu.memory_space<vmem>>, vector<1x2x1xf32>
    %53 = vector.shape_cast %52 : vector<1x2x1xf32> to vector<2x1xf32>
    %c9 = arith.constant 9 : index
    %c0_37 = arith.constant 0 : index
    %c0_38 = arith.constant 0 : index
    %54 = vector.load %arg3[%c9, %c0_37, %c0_38] : memref<24x2x1xf32, #tpu.memory_space<vmem>>, vector<1x2x1xf32>
    %55 = vector.shape_cast %54 : vector<1x2x1xf32> to vector<2x1xf32>
    %c10 = arith.constant 10 : index
    %c0_39 = arith.constant 0 : index
    %c0_40 = arith.constant 0 : index
    %56 = vector.load %arg3[%c10, %c0_39, %c0_40] : memref<24x2x1xf32, #tpu.memory_space<vmem>>, vector<1x2x1xf32>
    %57 = vector.shape_cast %56 : vector<1x2x1xf32> to vector<2x1xf32>
    %c11 = arith.constant 11 : index
    %c0_41 = arith.constant 0 : index
    %c0_42 = arith.constant 0 : index
    %58 = vector.load %arg3[%c11, %c0_41, %c0_42] : memref<24x2x1xf32, #tpu.memory_space<vmem>>, vector<1x2x1xf32>
    %59 = vector.shape_cast %58 : vector<1x2x1xf32> to vector<2x1xf32>
    %c12 = arith.constant 12 : index
    %c0_43 = arith.constant 0 : index
    %c0_44 = arith.constant 0 : index
    %60 = vector.load %arg3[%c12, %c0_43, %c0_44] : memref<24x2x1xf32, #tpu.memory_space<vmem>>, vector<1x2x1xf32>
    %61 = vector.shape_cast %60 : vector<1x2x1xf32> to vector<2x1xf32>
    %c13 = arith.constant 13 : index
    %c0_45 = arith.constant 0 : index
    %c0_46 = arith.constant 0 : index
    %62 = vector.load %arg3[%c13, %c0_45, %c0_46] : memref<24x2x1xf32, #tpu.memory_space<vmem>>, vector<1x2x1xf32>
    %63 = vector.shape_cast %62 : vector<1x2x1xf32> to vector<2x1xf32>
    %c14 = arith.constant 14 : index
    %c0_47 = arith.constant 0 : index
    %c0_48 = arith.constant 0 : index
    %64 = vector.load %arg3[%c14, %c0_47, %c0_48] : memref<24x2x1xf32, #tpu.memory_space<vmem>>, vector<1x2x1xf32>
    %65 = vector.shape_cast %64 : vector<1x2x1xf32> to vector<2x1xf32>
    %c15 = arith.constant 15 : index
    %c0_49 = arith.constant 0 : index
    %c0_50 = arith.constant 0 : index
    %66 = vector.load %arg3[%c15, %c0_49, %c0_50] : memref<24x2x1xf32, #tpu.memory_space<vmem>>, vector<1x2x1xf32>
    %67 = vector.shape_cast %66 : vector<1x2x1xf32> to vector<2x1xf32>
    %c16 = arith.constant 16 : index
    %c0_51 = arith.constant 0 : index
    %c0_52 = arith.constant 0 : index
    %68 = vector.load %arg3[%c16, %c0_51, %c0_52] : memref<24x2x1xf32, #tpu.memory_space<vmem>>, vector<1x2x1xf32>
    %69 = vector.shape_cast %68 : vector<1x2x1xf32> to vector<2x1xf32>
    %c17 = arith.constant 17 : index
    %c0_53 = arith.constant 0 : index
    %c0_54 = arith.constant 0 : index
    %70 = vector.load %arg3[%c17, %c0_53, %c0_54] : memref<24x2x1xf32, #tpu.memory_space<vmem>>, vector<1x2x1xf32>
    %71 = vector.shape_cast %70 : vector<1x2x1xf32> to vector<2x1xf32>
    %c18 = arith.constant 18 : index
    %c0_55 = arith.constant 0 : index
    %c0_56 = arith.constant 0 : index
    %72 = vector.load %arg3[%c18, %c0_55, %c0_56] : memref<24x2x1xf32, #tpu.memory_space<vmem>>, vector<1x2x1xf32>
    %73 = vector.shape_cast %72 : vector<1x2x1xf32> to vector<2x1xf32>
    %c19 = arith.constant 19 : index
    %c0_57 = arith.constant 0 : index
    %c0_58 = arith.constant 0 : index
    %74 = vector.load %arg3[%c19, %c0_57, %c0_58] : memref<24x2x1xf32, #tpu.memory_space<vmem>>, vector<1x2x1xf32>
    %75 = vector.shape_cast %74 : vector<1x2x1xf32> to vector<2x1xf32>
    %c20 = arith.constant 20 : index
    %c0_59 = arith.constant 0 : index
    %c0_60 = arith.constant 0 : index
    %76 = vector.load %arg3[%c20, %c0_59, %c0_60] : memref<24x2x1xf32, #tpu.memory_space<vmem>>, vector<1x2x1xf32>
    %77 = vector.shape_cast %76 : vector<1x2x1xf32> to vector<2x1xf32>
    %c21 = arith.constant 21 : index
    %c0_61 = arith.constant 0 : index
    %c0_62 = arith.constant 0 : index
    %78 = vector.load %arg3[%c21, %c0_61, %c0_62] : memref<24x2x1xf32, #tpu.memory_space<vmem>>, vector<1x2x1xf32>
    %79 = vector.shape_cast %78 : vector<1x2x1xf32> to vector<2x1xf32>
    %c22 = arith.constant 22 : index
    %c0_63 = arith.constant 0 : index
    %c0_64 = arith.constant 0 : index
    %80 = vector.load %arg3[%c22, %c0_63, %c0_64] : memref<24x2x1xf32, #tpu.memory_space<vmem>>, vector<1x2x1xf32>
    %81 = vector.shape_cast %80 : vector<1x2x1xf32> to vector<2x1xf32>
    %c23 = arith.constant 23 : index
    %c0_65 = arith.constant 0 : index
    %c0_66 = arith.constant 0 : index
    %82 = vector.load %arg3[%c23, %c0_65, %c0_66] : memref<24x2x1xf32, #tpu.memory_space<vmem>>, vector<1x2x1xf32>
    %83 = vector.shape_cast %82 : vector<1x2x1xf32> to vector<2x1xf32>
    %84 = vector.broadcast %15 : vector<1x128xf32> to vector<2x128xf32>
    %85 = vector.broadcast %49 : vector<2x1xf32> to vector<2x128xf32>
    %86 = arith.mulf %84, %85 : vector<2x128xf32>
    %87 = vector.broadcast %37 : vector<2x1xf32> to vector<2x128xf32>
    %88 = arith.subf %86, %87 : vector<2x128xf32>
    %89 = vector.broadcast %15 : vector<1x128xf32> to vector<2x128xf32>
    %90 = vector.broadcast %51 : vector<2x1xf32> to vector<2x128xf32>
    %91 = arith.mulf %89, %90 : vector<2x128xf32>
    %92 = vector.broadcast %39 : vector<2x1xf32> to vector<2x128xf32>
    %93 = arith.subf %91, %92 : vector<2x128xf32>
    %94 = vector.broadcast %15 : vector<1x128xf32> to vector<2x128xf32>
    %95 = vector.broadcast %53 : vector<2x1xf32> to vector<2x128xf32>
    %96 = arith.mulf %94, %95 : vector<2x128xf32>
    %97 = vector.broadcast %41 : vector<2x1xf32> to vector<2x128xf32>
    %98 = arith.subf %96, %97 : vector<2x128xf32>
    %99 = vector.broadcast %15 : vector<1x128xf32> to vector<2x128xf32>
    %100 = vector.broadcast %59 : vector<2x1xf32> to vector<2x128xf32>
    %101 = arith.mulf %99, %100 : vector<2x128xf32>
    %102 = vector.broadcast %55 : vector<2x1xf32> to vector<2x128xf32>
    %103 = arith.subf %102, %101 : vector<2x128xf32>
    %104 = vector.broadcast %19 : vector<1x128xf32> to vector<2x128xf32>
    %105 = vector.broadcast %49 : vector<2x1xf32> to vector<2x128xf32>
    %106 = arith.mulf %104, %105 : vector<2x128xf32>
    %107 = vector.broadcast %43 : vector<2x1xf32> to vector<2x128xf32>
    %108 = arith.subf %106, %107 : vector<2x128xf32>
    %109 = vector.broadcast %19 : vector<1x128xf32> to vector<2x128xf32>
    %110 = vector.broadcast %51 : vector<2x1xf32> to vector<2x128xf32>
    %111 = arith.mulf %109, %110 : vector<2x128xf32>
    %112 = vector.broadcast %45 : vector<2x1xf32> to vector<2x128xf32>
    %113 = arith.subf %111, %112 : vector<2x128xf32>
    %114 = vector.broadcast %19 : vector<1x128xf32> to vector<2x128xf32>
    %115 = vector.broadcast %53 : vector<2x1xf32> to vector<2x128xf32>
    %116 = arith.mulf %114, %115 : vector<2x128xf32>
    %117 = vector.broadcast %47 : vector<2x1xf32> to vector<2x128xf32>
    %118 = arith.subf %116, %117 : vector<2x128xf32>
    %119 = vector.broadcast %19 : vector<1x128xf32> to vector<2x128xf32>
    %120 = vector.broadcast %59 : vector<2x1xf32> to vector<2x128xf32>
    %121 = arith.mulf %119, %120 : vector<2x128xf32>
    %122 = vector.broadcast %57 : vector<2x1xf32> to vector<2x128xf32>
    %123 = arith.subf %122, %121 : vector<2x128xf32>
    %124 = vector.broadcast %73 : vector<2x1xf32> to vector<2x128xf32>
    %125 = arith.mulf %31, %124 : vector<2x128xf32>
    %126 = vector.broadcast %61 : vector<2x1xf32> to vector<2x128xf32>
    %127 = arith.subf %125, %126 : vector<2x128xf32>
    %128 = vector.broadcast %75 : vector<2x1xf32> to vector<2x128xf32>
    %129 = arith.mulf %31, %128 : vector<2x128xf32>
    %130 = vector.broadcast %63 : vector<2x1xf32> to vector<2x128xf32>
    %131 = arith.subf %129, %130 : vector<2x128xf32>
    %132 = vector.broadcast %77 : vector<2x1xf32> to vector<2x128xf32>
    %133 = arith.mulf %31, %132 : vector<2x128xf32>
    %134 = vector.broadcast %65 : vector<2x1xf32> to vector<2x128xf32>
    %135 = arith.subf %133, %134 : vector<2x128xf32>
    %136 = vector.broadcast %83 : vector<2x1xf32> to vector<2x128xf32>
    %137 = arith.mulf %31, %136 : vector<2x128xf32>
    %138 = vector.broadcast %79 : vector<2x1xf32> to vector<2x128xf32>
    %139 = arith.subf %138, %137 : vector<2x128xf32>
    %140 = vector.broadcast %73 : vector<2x1xf32> to vector<2x128xf32>
    %141 = arith.mulf %35, %140 : vector<2x128xf32>
    %142 = vector.broadcast %67 : vector<2x1xf32> to vector<2x128xf32>
    %143 = arith.subf %141, %142 : vector<2x128xf32>
    %144 = vector.broadcast %75 : vector<2x1xf32> to vector<2x128xf32>
    %145 = arith.mulf %35, %144 : vector<2x128xf32>
    %146 = vector.broadcast %69 : vector<2x1xf32> to vector<2x128xf32>
    %147 = arith.subf %145, %146 : vector<2x128xf32>
    %148 = vector.broadcast %77 : vector<2x1xf32> to vector<2x128xf32>
    %149 = arith.mulf %35, %148 : vector<2x128xf32>
    %150 = vector.broadcast %71 : vector<2x1xf32> to vector<2x128xf32>
    %151 = arith.subf %149, %150 : vector<2x128xf32>
    %152 = vector.broadcast %83 : vector<2x1xf32> to vector<2x128xf32>
    %153 = arith.mulf %35, %152 : vector<2x128xf32>
    %154 = vector.broadcast %81 : vector<2x1xf32> to vector<2x128xf32>
    %155 = arith.subf %154, %153 : vector<2x128xf32>
    %156 = arith.mulf %88, %88 : vector<2x128xf32>
    %157 = arith.mulf %88, %93 : vector<2x128xf32>
    %158 = arith.mulf %88, %98 : vector<2x128xf32>
    %159 = arith.mulf %93, %93 : vector<2x128xf32>
    %160 = arith.mulf %93, %98 : vector<2x128xf32>
    %161 = arith.mulf %98, %98 : vector<2x128xf32>
    %162 = arith.mulf %88, %103 : vector<2x128xf32>
    %163 = arith.mulf %93, %103 : vector<2x128xf32>
    %164 = arith.mulf %98, %103 : vector<2x128xf32>
    %165 = arith.mulf %108, %108 : vector<2x128xf32>
    %166 = arith.mulf %108, %113 : vector<2x128xf32>
    %167 = arith.mulf %108, %118 : vector<2x128xf32>
    %168 = arith.mulf %113, %113 : vector<2x128xf32>
    %169 = arith.mulf %113, %118 : vector<2x128xf32>
    %170 = arith.mulf %118, %118 : vector<2x128xf32>
    %171 = arith.mulf %108, %123 : vector<2x128xf32>
    %172 = arith.mulf %113, %123 : vector<2x128xf32>
    %173 = arith.mulf %118, %123 : vector<2x128xf32>
    %174 = arith.addf %156, %165 : vector<2x128xf32>
    %175 = arith.addf %157, %166 : vector<2x128xf32>
    %176 = arith.addf %158, %167 : vector<2x128xf32>
    %177 = arith.addf %159, %168 : vector<2x128xf32>
    %178 = arith.addf %160, %169 : vector<2x128xf32>
    %179 = arith.addf %161, %170 : vector<2x128xf32>
    %180 = arith.addf %162, %171 : vector<2x128xf32>
    %181 = arith.addf %163, %172 : vector<2x128xf32>
    %182 = arith.addf %164, %173 : vector<2x128xf32>
    %183 = arith.mulf %127, %127 : vector<2x128xf32>
    %184 = arith.mulf %127, %131 : vector<2x128xf32>
    %185 = arith.mulf %127, %135 : vector<2x128xf32>
    %186 = arith.mulf %131, %131 : vector<2x128xf32>
    %187 = arith.mulf %131, %135 : vector<2x128xf32>
    %188 = arith.mulf %135, %135 : vector<2x128xf32>
    %189 = arith.mulf %127, %139 : vector<2x128xf32>
    %190 = arith.mulf %131, %139 : vector<2x128xf32>
    %191 = arith.mulf %135, %139 : vector<2x128xf32>
    %192 = arith.addf %174, %183 : vector<2x128xf32>
    %193 = arith.addf %175, %184 : vector<2x128xf32>
    %194 = arith.addf %176, %185 : vector<2x128xf32>
    %195 = arith.addf %177, %186 : vector<2x128xf32>
    %196 = arith.addf %178, %187 : vector<2x128xf32>
    %197 = arith.addf %179, %188 : vector<2x128xf32>
    %198 = arith.addf %180, %189 : vector<2x128xf32>
    %199 = arith.addf %181, %190 : vector<2x128xf32>
    %200 = arith.addf %182, %191 : vector<2x128xf32>
    %201 = arith.mulf %143, %143 : vector<2x128xf32>
    %202 = arith.mulf %143, %147 : vector<2x128xf32>
    %203 = arith.mulf %143, %151 : vector<2x128xf32>
    %204 = arith.mulf %147, %147 : vector<2x128xf32>
    %205 = arith.mulf %147, %151 : vector<2x128xf32>
    %206 = arith.mulf %151, %151 : vector<2x128xf32>
    %207 = arith.mulf %143, %155 : vector<2x128xf32>
    %208 = arith.mulf %147, %155 : vector<2x128xf32>
    %209 = arith.mulf %151, %155 : vector<2x128xf32>
    %210 = arith.addf %192, %201 : vector<2x128xf32>
    %211 = arith.addf %193, %202 : vector<2x128xf32>
    %212 = arith.addf %194, %203 : vector<2x128xf32>
    %213 = arith.addf %195, %204 : vector<2x128xf32>
    %214 = arith.addf %196, %205 : vector<2x128xf32>
    %215 = arith.addf %197, %206 : vector<2x128xf32>
    %216 = arith.addf %198, %207 : vector<2x128xf32>
    %217 = arith.addf %199, %208 : vector<2x128xf32>
    %218 = arith.addf %200, %209 : vector<2x128xf32>
    %219 = arith.mulf %213, %215 : vector<2x128xf32>
    %220 = arith.mulf %214, %214 : vector<2x128xf32>
    %221 = arith.subf %219, %220 : vector<2x128xf32>
    %222 = arith.mulf %210, %221 : vector<2x128xf32>
    %223 = arith.mulf %211, %215 : vector<2x128xf32>
    %224 = arith.mulf %212, %214 : vector<2x128xf32>
    %225 = arith.subf %223, %224 : vector<2x128xf32>
    %226 = arith.mulf %211, %225 : vector<2x128xf32>
    %227 = arith.subf %222, %226 : vector<2x128xf32>
    %228 = arith.mulf %211, %214 : vector<2x128xf32>
    %229 = arith.mulf %212, %213 : vector<2x128xf32>
    %230 = arith.subf %228, %229 : vector<2x128xf32>
    %231 = arith.mulf %212, %230 : vector<2x128xf32>
    %232 = arith.addf %227, %231 : vector<2x128xf32>
    %233 = tpu.reciprocal %232 {approx = true} : vector<2x128xf32> -> vector<2x128xf32>
    %234 = arith.mulf %232, %233 : vector<2x128xf32>
    %cst_67 = arith.constant 2.000000e+00 : f32
    %235 = vector.broadcast %cst_67 : f32 to vector<2x128xf32>
    %236 = arith.subf %235, %234 : vector<2x128xf32>
    %237 = arith.mulf %233, %236 : vector<2x128xf32>
    %238 = arith.mulf %213, %215 : vector<2x128xf32>
    %239 = arith.mulf %214, %214 : vector<2x128xf32>
    %240 = arith.subf %238, %239 : vector<2x128xf32>
    %241 = arith.mulf %212, %214 : vector<2x128xf32>
    %242 = arith.mulf %211, %215 : vector<2x128xf32>
    %243 = arith.subf %241, %242 : vector<2x128xf32>
    %244 = arith.mulf %211, %214 : vector<2x128xf32>
    %245 = arith.mulf %212, %213 : vector<2x128xf32>
    %246 = arith.subf %244, %245 : vector<2x128xf32>
    %247 = arith.mulf %210, %215 : vector<2x128xf32>
    %248 = arith.mulf %212, %212 : vector<2x128xf32>
    %249 = arith.subf %247, %248 : vector<2x128xf32>
    %250 = arith.mulf %211, %212 : vector<2x128xf32>
    %251 = arith.mulf %210, %214 : vector<2x128xf32>
    %252 = arith.subf %250, %251 : vector<2x128xf32>
    %253 = arith.mulf %210, %213 : vector<2x128xf32>
    %254 = arith.mulf %211, %211 : vector<2x128xf32>
    %255 = arith.subf %253, %254 : vector<2x128xf32>
    %256 = arith.mulf %240, %216 : vector<2x128xf32>
    %257 = arith.mulf %243, %217 : vector<2x128xf32>
    %258 = arith.addf %256, %257 : vector<2x128xf32>
    %259 = arith.mulf %246, %218 : vector<2x128xf32>
    %260 = arith.addf %258, %259 : vector<2x128xf32>
    %261 = arith.mulf %260, %237 : vector<2x128xf32>
    %262 = arith.mulf %243, %216 : vector<2x128xf32>
    %263 = arith.mulf %249, %217 : vector<2x128xf32>
    %264 = arith.addf %262, %263 : vector<2x128xf32>
    %265 = arith.mulf %252, %218 : vector<2x128xf32>
    %266 = arith.addf %264, %265 : vector<2x128xf32>
    %267 = arith.mulf %266, %237 : vector<2x128xf32>
    %268 = arith.mulf %246, %216 : vector<2x128xf32>
    %269 = arith.mulf %252, %217 : vector<2x128xf32>
    %270 = arith.addf %268, %269 : vector<2x128xf32>
    %271 = arith.mulf %255, %218 : vector<2x128xf32>
    %272 = arith.addf %270, %271 : vector<2x128xf32>
    %273 = arith.mulf %272, %237 : vector<2x128xf32>
    %274 = vector.broadcast %41 : vector<2x1xf32> to vector<2x128xf32>
    %275 = arith.mulf %261, %274 : vector<2x128xf32>
    %276 = vector.broadcast %47 : vector<2x1xf32> to vector<2x128xf32>
    %277 = arith.mulf %267, %276 : vector<2x128xf32>
    %278 = arith.addf %275, %277 : vector<2x128xf32>
    %279 = vector.broadcast %53 : vector<2x1xf32> to vector<2x128xf32>
    %280 = arith.mulf %273, %279 : vector<2x128xf32>
    %281 = arith.addf %278, %280 : vector<2x128xf32>
    %282 = vector.broadcast %59 : vector<2x1xf32> to vector<2x128xf32>
    %283 = arith.addf %281, %282 : vector<2x128xf32>
    %284 = vector.broadcast %65 : vector<2x1xf32> to vector<2x128xf32>
    %285 = arith.mulf %261, %284 : vector<2x128xf32>
    %286 = vector.broadcast %71 : vector<2x1xf32> to vector<2x128xf32>
    %287 = arith.mulf %267, %286 : vector<2x128xf32>
    %288 = arith.addf %285, %287 : vector<2x128xf32>
    %289 = vector.broadcast %77 : vector<2x1xf32> to vector<2x128xf32>
    %290 = arith.mulf %273, %289 : vector<2x128xf32>
    %291 = arith.addf %288, %290 : vector<2x128xf32>
    %292 = vector.broadcast %83 : vector<2x1xf32> to vector<2x128xf32>
    %293 = arith.addf %291, %292 : vector<2x128xf32>
    %cst_68 = arith.constant 0.000000e+00 : f32
    %294 = vector.broadcast %cst_68 : f32 to vector<2x128xf32>
    %295 = arith.subf %294, %283 : vector<2x128xf32>
    %cst_69 = arith.constant 0.000000e+00 : f32
    %296 = vector.broadcast %cst_69 : f32 to vector<2x128xf32>
    %297 = arith.maximumf %295, %296 : vector<2x128xf32>
    %cst_70 = arith.constant dense<0.000000e+00> : vector<2xf32>
    %298 = vector.multi_reduction <add>, %297, %cst_70 [1] : vector<2x128xf32> to vector<2xf32>
    %299 = vector.shape_cast %298 : vector<2xf32> to vector<2x1xf32>
    %300 = math.absf %283 : vector<2x128xf32>
    %cst_71 = arith.constant dense<0.000000e+00> : vector<2xf32>
    %301 = vector.multi_reduction <add>, %300, %cst_71 [1] : vector<2x128xf32> to vector<2xf32>
    %302 = vector.shape_cast %301 : vector<2xf32> to vector<2x1xf32>
    %cst_72 = arith.constant 0.000000e+00 : f32
    %303 = vector.broadcast %cst_72 : f32 to vector<2x128xf32>
    %304 = arith.subf %303, %293 : vector<2x128xf32>
    %cst_73 = arith.constant 0.000000e+00 : f32
    %305 = vector.broadcast %cst_73 : f32 to vector<2x128xf32>
    %306 = arith.maximumf %304, %305 : vector<2x128xf32>
    %cst_74 = arith.constant dense<0.000000e+00> : vector<2xf32>
    %307 = vector.multi_reduction <add>, %306, %cst_74 [1] : vector<2x128xf32> to vector<2xf32>
    %308 = vector.shape_cast %307 : vector<2xf32> to vector<2x1xf32>
    %309 = math.absf %293 : vector<2x128xf32>
    %cst_75 = arith.constant dense<0.000000e+00> : vector<2xf32>
    %310 = vector.multi_reduction <add>, %309, %cst_75 [1] : vector<2x128xf32> to vector<2xf32>
    %311 = vector.shape_cast %310 : vector<2xf32> to vector<2x1xf32>
    %312 = arith.divf %299, %302 : vector<2x1xf32>
    %313 = arith.divf %308, %311 : vector<2x1xf32>
    %314 = arith.addf %312, %313 : vector<2x1xf32>
    %cst_76 = arith.constant dense<0.000000e+00> : vector<1xf32>
    %315 = vector.multi_reduction <add>, %314, %cst_76 [0] : vector<2x1xf32> to vector<1xf32>
    %316 = vector.shape_cast %315 : vector<1xf32> to vector<1x1xf32>
    %317 = tpu.concatenate %283, %293 in 0 : vector<2x128xf32>, vector<2x128xf32> -> vector<4x128xf32>
    %318 = vector.extract_strided_slice %317 {offsets = [0, 0], sizes = [1, 128], strides = [1, 1]} : vector<4x128xf32> to vector<1x128xf32>
    %cst_77 = arith.constant 1.000000e+00 : f32
    %319 = vector.broadcast %cst_77 : f32 to vector<1x128xf32>
    %320 = arith.mulf %318, %319 : vector<1x128xf32>
    %321 = vector.extract_strided_slice %317 {offsets = [1, 0], sizes = [1, 128], strides = [1, 1]} : vector<4x128xf32> to vector<1x128xf32>
    %322 = vector.extract_strided_slice %317 {offsets = [2, 0], sizes = [1, 128], strides = [1, 1]} : vector<4x128xf32> to vector<1x128xf32>
    %323 = arith.addf %321, %322 : vector<1x128xf32>
    %cst_78 = arith.constant 5.000000e-01 : f32
    %324 = vector.broadcast %cst_78 : f32 to vector<1x128xf32>
    %325 = arith.mulf %323, %324 : vector<1x128xf32>
    %326 = vector.extract_strided_slice %317 {offsets = [3, 0], sizes = [1, 128], strides = [1, 1]} : vector<4x128xf32> to vector<1x128xf32>
    %cst_79 = arith.constant 1.000000e+00 : f32
    %327 = vector.broadcast %cst_79 : f32 to vector<1x128xf32>
    %328 = arith.mulf %326, %327 : vector<1x128xf32>
    %329 = tpu.concatenate %320, %325, %328 in 0 : vector<1x128xf32>, vector<1x128xf32>, vector<1x128xf32> -> vector<3x128xf32>
    %330 = tpu.concatenate %320, %325, %325, %328 in 0 : vector<1x128xf32>, vector<1x128xf32>, vector<1x128xf32>, vector<1x128xf32> -> vector<4x128xf32>
    %331 = arith.subf %330, %317 : vector<4x128xf32>
    %332 = math.absf %331 : vector<4x128xf32>
    %cst_80 = arith.constant dense<0.000000e+00> : vector<4xf32>
    %333 = vector.multi_reduction <add>, %332, %cst_80 [1] : vector<4x128xf32> to vector<4xf32>
    %334 = vector.shape_cast %333 : vector<4xf32> to vector<4x1xf32>
    %335 = math.absf %329 : vector<3x128xf32>
    %cst_81 = arith.constant dense<0.000000e+00> : vector<3xf32>
    %336 = vector.multi_reduction <add>, %335, %cst_81 [1] : vector<3x128xf32> to vector<3xf32>
    %337 = vector.shape_cast %336 : vector<3xf32> to vector<3x1xf32>
    %cst_82 = arith.constant 0.000000e+00 : f32
    %338 = vector.broadcast %cst_82 : f32 to vector<1x1xf32>
    %339 = vector.extract_strided_slice %334 {offsets = [0, 0], sizes = [1, 1], strides = [1, 1]} : vector<4x1xf32> to vector<1x1xf32>
    %340 = vector.extract_strided_slice %337 {offsets = [0, 0], sizes = [1, 1], strides = [1, 1]} : vector<3x1xf32> to vector<1x1xf32>
    %cst_83 = arith.constant 1.000000e+00 : f32
    %341 = vector.broadcast %cst_83 : f32 to vector<1x1xf32>
    %342 = arith.mulf %340, %341 : vector<1x1xf32>
    %343 = arith.divf %339, %342 : vector<1x1xf32>
    %344 = arith.addf %338, %343 : vector<1x1xf32>
    %345 = vector.extract_strided_slice %334 {offsets = [1, 0], sizes = [1, 1], strides = [1, 1]} : vector<4x1xf32> to vector<1x1xf32>
    %346 = vector.extract_strided_slice %334 {offsets = [2, 0], sizes = [1, 1], strides = [1, 1]} : vector<4x1xf32> to vector<1x1xf32>
    %347 = arith.addf %345, %346 : vector<1x1xf32>
    %348 = vector.extract_strided_slice %337 {offsets = [1, 0], sizes = [1, 1], strides = [1, 1]} : vector<3x1xf32> to vector<1x1xf32>
    %cst_84 = arith.constant 4.000000e+00 : f32
    %349 = vector.broadcast %cst_84 : f32 to vector<1x1xf32>
    %350 = arith.mulf %348, %349 : vector<1x1xf32>
    %351 = arith.divf %347, %350 : vector<1x1xf32>
    %352 = arith.addf %344, %351 : vector<1x1xf32>
    %353 = vector.extract_strided_slice %334 {offsets = [3, 0], sizes = [1, 1], strides = [1, 1]} : vector<4x1xf32> to vector<1x1xf32>
    %354 = vector.extract_strided_slice %337 {offsets = [2, 0], sizes = [1, 1], strides = [1, 1]} : vector<3x1xf32> to vector<1x1xf32>
    %cst_85 = arith.constant 1.000000e+00 : f32
    %355 = vector.broadcast %cst_85 : f32 to vector<1x1xf32>
    %356 = arith.mulf %354, %355 : vector<1x1xf32>
    %357 = arith.divf %353, %356 : vector<1x1xf32>
    %358 = arith.addf %352, %357 : vector<1x1xf32>
    %cst_86 = arith.constant dense<0.000000e+00> : vector<3xf32>
    %359 = vector.multi_reduction <add>, %329, %cst_86 [1] : vector<3x128xf32> to vector<3xf32>
    %360 = vector.shape_cast %359 : vector<3xf32> to vector<3x1xf32>
    %cst_87 = arith.constant dense<0.000000e+00> : vector<1xf32>
    %361 = vector.multi_reduction <add>, %360, %cst_87 [0] : vector<3x1xf32> to vector<1xf32>
    %362 = vector.shape_cast %361 : vector<1xf32> to vector<1x1xf32>
    %cst_88 = arith.constant 3.840000e+02 : f32
    %363 = vector.broadcast %cst_88 : f32 to vector<1x1xf32>
    %364 = arith.divf %363, %362 : vector<1x1xf32>
    %365 = vector.broadcast %364 : vector<1x1xf32> to vector<3x128xf32>
    %366 = arith.mulf %329, %365 : vector<3x128xf32>
    %367 = arith.mulf %15, %15 : vector<1x128xf32>
    %368 = arith.mulf %19, %19 : vector<1x128xf32>
    %369 = arith.addf %367, %368 : vector<1x128xf32>
    %370 = vector.broadcast %4 : f32 to vector<1x128xf32>
    %371 = arith.mulf %370, %369 : vector<1x128xf32>
    %cst_89 = arith.constant 1.000000e+00 : f32
    %372 = vector.broadcast %cst_89 : f32 to vector<1x128xf32>
    %373 = arith.addf %372, %371 : vector<1x128xf32>
    %374 = vector.broadcast %5 : f32 to vector<1x128xf32>
    %375 = arith.mulf %374, %369 : vector<1x128xf32>
    %376 = arith.mulf %375, %369 : vector<1x128xf32>
    %377 = arith.addf %373, %376 : vector<1x128xf32>
    %378 = arith.mulf %15, %377 : vector<1x128xf32>
    %cst_90 = arith.constant 2.000000e+00 : f32
    %379 = arith.mulf %cst_90, %6 : f32
    %380 = vector.broadcast %379 : f32 to vector<1x128xf32>
    %381 = arith.mulf %380, %15 : vector<1x128xf32>
    %382 = arith.mulf %381, %19 : vector<1x128xf32>
    %383 = arith.addf %378, %382 : vector<1x128xf32>
    %cst_91 = arith.constant 2.000000e+00 : f32
    %384 = vector.broadcast %cst_91 : f32 to vector<1x128xf32>
    %385 = arith.mulf %384, %15 : vector<1x128xf32>
    %386 = arith.mulf %385, %15 : vector<1x128xf32>
    %387 = arith.addf %369, %386 : vector<1x128xf32>
    %388 = vector.broadcast %7 : f32 to vector<1x128xf32>
    %389 = arith.mulf %388, %387 : vector<1x128xf32>
    %390 = arith.addf %383, %389 : vector<1x128xf32>
    %391 = arith.mulf %19, %377 : vector<1x128xf32>
    %cst_92 = arith.constant 2.000000e+00 : f32
    %392 = arith.mulf %cst_92, %7 : f32
    %393 = vector.broadcast %392 : f32 to vector<1x128xf32>
    %394 = arith.mulf %393, %15 : vector<1x128xf32>
    %395 = arith.mulf %394, %19 : vector<1x128xf32>
    %396 = arith.addf %391, %395 : vector<1x128xf32>
    %cst_93 = arith.constant 2.000000e+00 : f32
    %397 = vector.broadcast %cst_93 : f32 to vector<1x128xf32>
    %398 = arith.mulf %397, %19 : vector<1x128xf32>
    %399 = arith.mulf %398, %19 : vector<1x128xf32>
    %400 = arith.addf %369, %399 : vector<1x128xf32>
    %401 = vector.broadcast %6 : f32 to vector<1x128xf32>
    %402 = arith.mulf %401, %400 : vector<1x128xf32>
    %403 = arith.addf %396, %402 : vector<1x128xf32>
    %404 = vector.broadcast %390 : vector<1x128xf32> to vector<3x128xf32>
    %405 = arith.mulf %404, %366 : vector<3x128xf32>
    %406 = vector.broadcast %403 : vector<1x128xf32> to vector<3x128xf32>
    %407 = arith.mulf %406, %366 : vector<3x128xf32>
    %c0_94 = arith.constant 0 : index
    %c0_95 = arith.constant 0 : index
    %408 = vector.load %arg6[%c0_94, %c0_95] : memref<3x128xf32, #tpu.memory_space<vmem>>, vector<3x128xf32>
    tpu.vector_store %arg6[%c0_94, %c0_95], %366 {strides = array<i32>} : memref<3x128xf32, #tpu.memory_space<vmem>>, vector<3x128xf32>,
    %409 = tpu.concatenate %405, %407, %366 in 0 : vector<3x128xf32>, vector<3x128xf32>, vector<3x128xf32> -> vector<9x128xf32>
    %c0_96 = arith.constant 0 : index
    %c0_97 = arith.constant 0 : index
    %410 = vector.load %arg7[%c0_96, %c0_97] : memref<9x128xf32, #tpu.memory_space<vmem>>, vector<9x128xf32>
    tpu.vector_store %arg7[%c0_96, %c0_97], %409 {strides = array<i32>} : memref<9x128xf32, #tpu.memory_space<vmem>>, vector<9x128xf32>,
    %411 = tpu.iota {dimensions = array<i32: 0>} : vector<16x128xi32>
    %412 = tpu.iota {dimensions = array<i32: 0>} : vector<8x128xi32>
    %cst_98 = arith.constant 0.000000e+00 : f32
    %413 = vector.broadcast %cst_98 : f32 to vector<7x128xf32>
    %414 = tpu.concatenate %409, %413 in 0 : vector<9x128xf32>, vector<7x128xf32> -> vector<16x128xf32>
    %c0_99 = arith.constant 0 : index
    %c0_100 = arith.constant 0 : index
    %415 = vector.load %arg2[%c0_99, %c0_100] : memref<128x128xf32, #tpu.memory_space<vmem>>, vector<128x128xf32>
    %cst_101 = arith.constant dense<0.000000e+00> : vector<16x128xf32>
    %416 = tpu.matmul %414, %415, %cst_101 {dimension_numbers = #tpu.dot_dimension_numbers<[1], [0], [0], [1], [0, 0, 1, 1], [], []>} : vector<16x128xf32>, vector<128x128xf32>, vector<16x128xf32> -> vector<16x128xf32>
    %cst_102 = arith.constant 0.000000e+00 : f32
    %417 = vector.broadcast %cst_102 : f32 to vector<5x128xf32>
    %cst_103 = arith.constant 0.000000e+00 : f32
    %418 = vector.broadcast %cst_103 : f32 to vector<1x1xf32>
    %419 = vector.extract_strided_slice %25 {offsets = [0, 0], sizes = [1, 128], strides = [1, 1]} : vector<2x128xf32> to vector<1x128xf32>
    %420 = vector.extract_strided_slice %27 {offsets = [0, 0], sizes = [1, 128], strides = [1, 1]} : vector<2x128xf32> to vector<1x128xf32>
    %cst_104 = arith.constant 1.06666672 : f32
    %421 = vector.broadcast %cst_104 : f32 to vector<1x128xf32>
    %422 = arith.mulf %419, %421 : vector<1x128xf32>
    %cst_105 = arith.constant 5.000000e-01 : f32
    %423 = vector.broadcast %cst_105 : f32 to vector<1x128xf32>
    %424 = arith.subf %422, %423 : vector<1x128xf32>
    %cst_106 = arith.constant 0.000000e+00 : f32
    %cst_107 = arith.constant 1.500000e+01 : f32
    %425 = vector.broadcast %cst_106 : f32 to vector<1x128xf32>
    %426 = arith.maximumf %425, %424 : vector<1x128xf32>
    %427 = vector.broadcast %cst_107 : f32 to vector<1x128xf32>
    %428 = arith.minimumf %427, %426 : vector<1x128xf32>
    %cst_108 = arith.constant 1.14285719 : f32
    %429 = vector.broadcast %cst_108 : f32 to vector<1x128xf32>
    %430 = arith.mulf %420, %429 : vector<1x128xf32>
    %cst_109 = arith.constant 5.000000e-01 : f32
    %431 = vector.broadcast %cst_109 : f32 to vector<1x128xf32>
    %432 = arith.subf %430, %431 : vector<1x128xf32>
    %cst_110 = arith.constant 0.000000e+00 : f32
    %cst_111 = arith.constant 7.000000e+00 : f32
    %433 = vector.broadcast %cst_110 : f32 to vector<1x128xf32>
    %434 = arith.maximumf %433, %432 : vector<1x128xf32>
    %435 = vector.broadcast %cst_111 : f32 to vector<1x128xf32>
    %436 = arith.minimumf %435, %434 : vector<1x128xf32>
    %437 = math.floor %428 : vector<1x128xf32>
    %438 = math.floor %436 : vector<1x128xf32>
    %439 = arith.subf %428, %437 : vector<1x128xf32>
    %440 = arith.subf %436, %438 : vector<1x128xf32>
    %441 = arith.fptosi %437 : vector<1x128xf32> to vector<1x128xi32>
    %442 = arith.fptosi %438 : vector<1x128xf32> to vector<1x128xi32>
    %c1_i32 = arith.constant 1 : i32
    %443 = vector.broadcast %c1_i32 : i32 to vector<1x128xi32>
    %444 = arith.addi %441, %443 : vector<1x128xi32>
    %c15_i32 = arith.constant 15 : i32
    %445 = vector.broadcast %c15_i32 : i32 to vector<1x128xi32>
    %446 = arith.minsi %444, %445 : vector<1x128xi32>
    %c1_i32_112 = arith.constant 1 : i32
    %447 = vector.broadcast %c1_i32_112 : i32 to vector<1x128xi32>
    %448 = arith.addi %442, %447 : vector<1x128xi32>
    %c7_i32 = arith.constant 7 : i32
    %449 = vector.broadcast %c7_i32 : i32 to vector<1x128xi32>
    %450 = arith.minsi %448, %449 : vector<1x128xi32>
    %451 = vector.broadcast %441 : vector<1x128xi32> to vector<16x128xi32>
    %452 = arith.cmpi eq, %411, %451 : vector<16x128xi32>
    %cst_113 = arith.constant 1.000000e+00 : f32
    %453 = vector.broadcast %cst_113 : f32 to vector<1x128xf32>
    %454 = arith.subf %453, %439 : vector<1x128xf32>
    %cst_114 = arith.constant 0.000000e+00 : f32
    %455 = vector.shape_cast %454 : vector<1x128xf32> to vector<1x128xf32>
    %456 = vector.broadcast %455 : vector<1x128xf32> to vector<16x128xf32>
    %457 = vector.broadcast %cst_114 : f32 to vector<16x128xf32>
    %458 = arith.select %452, %456, %457 : vector<16x128xi1>, vector<16x128xf32>
    %459 = vector.broadcast %446 : vector<1x128xi32> to vector<16x128xi32>
    %460 = arith.cmpi eq, %411, %459 : vector<16x128xi32>
    %cst_115 = arith.constant 0.000000e+00 : f32
    %461 = vector.shape_cast %439 : vector<1x128xf32> to vector<1x128xf32>
    %462 = vector.broadcast %461 : vector<1x128xf32> to vector<16x128xf32>
    %463 = vector.broadcast %cst_115 : f32 to vector<16x128xf32>
    %464 = arith.select %460, %462, %463 : vector<16x128xi1>, vector<16x128xf32>
    %465 = arith.addf %458, %464 : vector<16x128xf32>
    %466 = vector.broadcast %442 : vector<1x128xi32> to vector<8x128xi32>
    %467 = arith.cmpi eq, %412, %466 : vector<8x128xi32>
    %cst_116 = arith.constant 1.000000e+00 : f32
    %468 = vector.broadcast %cst_116 : f32 to vector<1x128xf32>
    %469 = arith.subf %468, %440 : vector<1x128xf32>
    %cst_117 = arith.constant 0.000000e+00 : f32
    %470 = vector.shape_cast %469 : vector<1x128xf32> to vector<1x128xf32>
    %471 = vector.broadcast %470 : vector<1x128xf32> to vector<8x128xf32>
    %472 = vector.broadcast %cst_117 : f32 to vector<8x128xf32>
    %473 = arith.select %467, %471, %472 : vector<8x128xi1>, vector<8x128xf32>
    %474 = vector.broadcast %450 : vector<1x128xi32> to vector<8x128xi32>
    %475 = arith.cmpi eq, %412, %474 : vector<8x128xi32>
    %cst_118 = arith.constant 0.000000e+00 : f32
    %476 = vector.shape_cast %440 : vector<1x128xf32> to vector<1x128xf32>
    %477 = vector.broadcast %476 : vector<1x128xf32> to vector<8x128xf32>
    %478 = vector.broadcast %cst_118 : f32 to vector<8x128xf32>
    %479 = arith.select %475, %477, %478 : vector<8x128xi1>, vector<8x128xf32>
    %480 = arith.addf %473, %479 : vector<8x128xf32>
    %481 = vector.extract_strided_slice %480 {offsets = [0, 0], sizes = [1, 128], strides = [1, 1]} : vector<8x128xf32> to vector<1x128xf32>
    %482 = vector.broadcast %481 : vector<1x128xf32> to vector<16x128xf32>
    %483 = arith.mulf %482, %465 : vector<16x128xf32>
    %484 = vector.extract_strided_slice %480 {offsets = [1, 0], sizes = [1, 128], strides = [1, 1]} : vector<8x128xf32> to vector<1x128xf32>
    %485 = vector.broadcast %484 : vector<1x128xf32> to vector<16x128xf32>
    %486 = arith.mulf %485, %465 : vector<16x128xf32>
    %487 = vector.extract_strided_slice %480 {offsets = [2, 0], sizes = [1, 128], strides = [1, 1]} : vector<8x128xf32> to vector<1x128xf32>
    %488 = vector.broadcast %487 : vector<1x128xf32> to vector<16x128xf32>
    %489 = arith.mulf %488, %465 : vector<16x128xf32>
    %490 = vector.extract_strided_slice %480 {offsets = [3, 0], sizes = [1, 128], strides = [1, 1]} : vector<8x128xf32> to vector<1x128xf32>
    %491 = vector.broadcast %490 : vector<1x128xf32> to vector<16x128xf32>
    %492 = arith.mulf %491, %465 : vector<16x128xf32>
    %493 = vector.extract_strided_slice %480 {offsets = [4, 0], sizes = [1, 128], strides = [1, 1]} : vector<8x128xf32> to vector<1x128xf32>
    %494 = vector.broadcast %493 : vector<1x128xf32> to vector<16x128xf32>
    %495 = arith.mulf %494, %465 : vector<16x128xf32>
    %496 = vector.extract_strided_slice %480 {offsets = [5, 0], sizes = [1, 128], strides = [1, 1]} : vector<8x128xf32> to vector<1x128xf32>
    %497 = vector.broadcast %496 : vector<1x128xf32> to vector<16x128xf32>
    %498 = arith.mulf %497, %465 : vector<16x128xf32>
    %499 = vector.extract_strided_slice %480 {offsets = [6, 0], sizes = [1, 128], strides = [1, 1]} : vector<8x128xf32> to vector<1x128xf32>
    %500 = vector.broadcast %499 : vector<1x128xf32> to vector<16x128xf32>
    %501 = arith.mulf %500, %465 : vector<16x128xf32>
    %502 = vector.extract_strided_slice %480 {offsets = [7, 0], sizes = [1, 128], strides = [1, 1]} : vector<8x128xf32> to vector<1x128xf32>
    %503 = vector.broadcast %502 : vector<1x128xf32> to vector<16x128xf32>
    %504 = arith.mulf %503, %465 : vector<16x128xf32>
    %505 = tpu.concatenate %483, %486, %489, %492, %495, %498, %501, %504 in 0 : vector<16x128xf32>, vector<16x128xf32>, vector<16x128xf32>, vector<16x128xf32>, vector<16x128xf32>, vector<16x128xf32>, vector<16x128xf32>, vector<16x128xf32> -> vector<128x128xf32>
    %506 = vector.extract_strided_slice %405 {offsets = [1, 0], sizes = [1, 128], strides = [1, 1]} : vector<3x128xf32> to vector<1x128xf32>
    %507 = vector.extract_strided_slice %407 {offsets = [1, 0], sizes = [1, 128], strides = [1, 1]} : vector<3x128xf32> to vector<1x128xf32>
    %508 = vector.extract_strided_slice %366 {offsets = [1, 0], sizes = [1, 128], strides = [1, 1]} : vector<3x128xf32> to vector<1x128xf32>
    %509 = tpu.concatenate %506, %507, %508, %417 in 0 : vector<1x128xf32>, vector<1x128xf32>, vector<1x128xf32>, vector<5x128xf32> -> vector<8x128xf32>
    %cst_119 = arith.constant dense<0.000000e+00> : vector<8x128xf32>
    %510 = tpu.matmul %509, %505, %cst_119 {dimension_numbers = #tpu.dot_dimension_numbers<[1], [0], [0], [1], [0, 0, 1, 1], [], []>} : vector<8x128xf32>, vector<128x128xf32>, vector<8x128xf32> -> vector<8x128xf32>
    %511 = vector.extract_strided_slice %510 {offsets = [0, 0], sizes = [1, 128], strides = [1, 1]} : vector<8x128xf32> to vector<1x128xf32>
    %512 = vector.extract_strided_slice %416 {offsets = [0, 0], sizes = [1, 128], strides = [1, 1]} : vector<16x128xf32> to vector<1x128xf32>
    %513 = arith.subf %511, %512 : vector<1x128xf32>
    %514 = vector.extract_strided_slice %510 {offsets = [1, 0], sizes = [1, 128], strides = [1, 1]} : vector<8x128xf32> to vector<1x128xf32>
    %515 = vector.extract_strided_slice %416 {offsets = [3, 0], sizes = [1, 128], strides = [1, 1]} : vector<16x128xf32> to vector<1x128xf32>
    %516 = arith.subf %514, %515 : vector<1x128xf32>
    %517 = vector.extract_strided_slice %510 {offsets = [2, 0], sizes = [1, 128], strides = [1, 1]} : vector<8x128xf32> to vector<1x128xf32>
    %518 = vector.extract_strided_slice %416 {offsets = [6, 0], sizes = [1, 128], strides = [1, 1]} : vector<16x128xf32> to vector<1x128xf32>
    %519 = arith.subf %517, %518 : vector<1x128xf32>
    %520 = arith.mulf %513, %513 : vector<1x128xf32>
    %521 = arith.mulf %516, %516 : vector<1x128xf32>
    %522 = arith.addf %520, %521 : vector<1x128xf32>
    %523 = arith.mulf %519, %519 : vector<1x128xf32>
    %524 = arith.addf %522, %523 : vector<1x128xf32>
    %cst_120 = arith.constant dense<0.000000e+00> : vector<1xf32>
    %525 = vector.multi_reduction <add>, %524, %cst_120 [1] : vector<1x128xf32> to vector<1xf32>
    %526 = vector.shape_cast %525 : vector<1xf32> to vector<1x1xf32>
    %cst_121 = arith.constant 0.00260416674 : f32
    %527 = vector.broadcast %cst_121 : f32 to vector<1x1xf32>
    %528 = arith.mulf %526, %527 : vector<1x1xf32>
    %529 = math.sqrt %528 : vector<1x1xf32>
    %530 = arith.addf %418, %529 : vector<1x1xf32>
    %531 = vector.extract_strided_slice %25 {offsets = [1, 0], sizes = [1, 128], strides = [1, 1]} : vector<2x128xf32> to vector<1x128xf32>
    %532 = vector.extract_strided_slice %27 {offsets = [1, 0], sizes = [1, 128], strides = [1, 1]} : vector<2x128xf32> to vector<1x128xf32>
    %cst_122 = arith.constant 1.06666672 : f32
    %533 = vector.broadcast %cst_122 : f32 to vector<1x128xf32>
    %534 = arith.mulf %531, %533 : vector<1x128xf32>
    %cst_123 = arith.constant 5.000000e-01 : f32
    %535 = vector.broadcast %cst_123 : f32 to vector<1x128xf32>
    %536 = arith.subf %534, %535 : vector<1x128xf32>
    %cst_124 = arith.constant 0.000000e+00 : f32
    %cst_125 = arith.constant 1.500000e+01 : f32
    %537 = vector.broadcast %cst_124 : f32 to vector<1x128xf32>
    %538 = arith.maximumf %537, %536 : vector<1x128xf32>
    %539 = vector.broadcast %cst_125 : f32 to vector<1x128xf32>
    %540 = arith.minimumf %539, %538 : vector<1x128xf32>
    %cst_126 = arith.constant 1.14285719 : f32
    %541 = vector.broadcast %cst_126 : f32 to vector<1x128xf32>
    %542 = arith.mulf %532, %541 : vector<1x128xf32>
    %cst_127 = arith.constant 5.000000e-01 : f32
    %543 = vector.broadcast %cst_127 : f32 to vector<1x128xf32>
    %544 = arith.subf %542, %543 : vector<1x128xf32>
    %cst_128 = arith.constant 0.000000e+00 : f32
    %cst_129 = arith.constant 7.000000e+00 : f32
    %545 = vector.broadcast %cst_128 : f32 to vector<1x128xf32>
    %546 = arith.maximumf %545, %544 : vector<1x128xf32>
    %547 = vector.broadcast %cst_129 : f32 to vector<1x128xf32>
    %548 = arith.minimumf %547, %546 : vector<1x128xf32>
    %549 = math.floor %540 : vector<1x128xf32>
    %550 = math.floor %548 : vector<1x128xf32>
    %551 = arith.subf %540, %549 : vector<1x128xf32>
    %552 = arith.subf %548, %550 : vector<1x128xf32>
    %553 = arith.fptosi %549 : vector<1x128xf32> to vector<1x128xi32>
    %554 = arith.fptosi %550 : vector<1x128xf32> to vector<1x128xi32>
    %c1_i32_130 = arith.constant 1 : i32
    %555 = vector.broadcast %c1_i32_130 : i32 to vector<1x128xi32>
    %556 = arith.addi %553, %555 : vector<1x128xi32>
    %c15_i32_131 = arith.constant 15 : i32
    %557 = vector.broadcast %c15_i32_131 : i32 to vector<1x128xi32>
    %558 = arith.minsi %556, %557 : vector<1x128xi32>
    %c1_i32_132 = arith.constant 1 : i32
    %559 = vector.broadcast %c1_i32_132 : i32 to vector<1x128xi32>
    %560 = arith.addi %554, %559 : vector<1x128xi32>
    %c7_i32_133 = arith.constant 7 : i32
    %561 = vector.broadcast %c7_i32_133 : i32 to vector<1x128xi32>
    %562 = arith.minsi %560, %561 : vector<1x128xi32>
    %563 = vector.broadcast %553 : vector<1x128xi32> to vector<16x128xi32>
    %564 = arith.cmpi eq, %411, %563 : vector<16x128xi32>
    %cst_134 = arith.constant 1.000000e+00 : f32
    %565 = vector.broadcast %cst_134 : f32 to vector<1x128xf32>
    %566 = arith.subf %565, %551 : vector<1x128xf32>
    %cst_135 = arith.constant 0.000000e+00 : f32
    %567 = vector.shape_cast %566 : vector<1x128xf32> to vector<1x128xf32>
    %568 = vector.broadcast %567 : vector<1x128xf32> to vector<16x128xf32>
    %569 = vector.broadcast %cst_135 : f32 to vector<16x128xf32>
    %570 = arith.select %564, %568, %569 : vector<16x128xi1>, vector<16x128xf32>
    %571 = vector.broadcast %558 : vector<1x128xi32> to vector<16x128xi32>
    %572 = arith.cmpi eq, %411, %571 : vector<16x128xi32>
    %cst_136 = arith.constant 0.000000e+00 : f32
    %573 = vector.shape_cast %551 : vector<1x128xf32> to vector<1x128xf32>
    %574 = vector.broadcast %573 : vector<1x128xf32> to vector<16x128xf32>
    %575 = vector.broadcast %cst_136 : f32 to vector<16x128xf32>
    %576 = arith.select %572, %574, %575 : vector<16x128xi1>, vector<16x128xf32>
    %577 = arith.addf %570, %576 : vector<16x128xf32>
    %578 = vector.broadcast %554 : vector<1x128xi32> to vector<8x128xi32>
    %579 = arith.cmpi eq, %412, %578 : vector<8x128xi32>
    %cst_137 = arith.constant 1.000000e+00 : f32
    %580 = vector.broadcast %cst_137 : f32 to vector<1x128xf32>
    %581 = arith.subf %580, %552 : vector<1x128xf32>
    %cst_138 = arith.constant 0.000000e+00 : f32
    %582 = vector.shape_cast %581 : vector<1x128xf32> to vector<1x128xf32>
    %583 = vector.broadcast %582 : vector<1x128xf32> to vector<8x128xf32>
    %584 = vector.broadcast %cst_138 : f32 to vector<8x128xf32>
    %585 = arith.select %579, %583, %584 : vector<8x128xi1>, vector<8x128xf32>
    %586 = vector.broadcast %562 : vector<1x128xi32> to vector<8x128xi32>
    %587 = arith.cmpi eq, %412, %586 : vector<8x128xi32>
    %cst_139 = arith.constant 0.000000e+00 : f32
    %588 = vector.shape_cast %552 : vector<1x128xf32> to vector<1x128xf32>
    %589 = vector.broadcast %588 : vector<1x128xf32> to vector<8x128xf32>
    %590 = vector.broadcast %cst_139 : f32 to vector<8x128xf32>
    %591 = arith.select %587, %589, %590 : vector<8x128xi1>, vector<8x128xf32>
    %592 = arith.addf %585, %591 : vector<8x128xf32>
    %593 = vector.extract_strided_slice %592 {offsets = [0, 0], sizes = [1, 128], strides = [1, 1]} : vector<8x128xf32> to vector<1x128xf32>
    %594 = vector.broadcast %593 : vector<1x128xf32> to vector<16x128xf32>
    %595 = arith.mulf %594, %577 : vector<16x128xf32>
    %596 = vector.extract_strided_slice %592 {offsets = [1, 0], sizes = [1, 128], strides = [1, 1]} : vector<8x128xf32> to vector<1x128xf32>
    %597 = vector.broadcast %596 : vector<1x128xf32> to vector<16x128xf32>
    %598 = arith.mulf %597, %577 : vector<16x128xf32>
    %599 = vector.extract_strided_slice %592 {offsets = [2, 0], sizes = [1, 128], strides = [1, 1]} : vector<8x128xf32> to vector<1x128xf32>
    %600 = vector.broadcast %599 : vector<1x128xf32> to vector<16x128xf32>
    %601 = arith.mulf %600, %577 : vector<16x128xf32>
    %602 = vector.extract_strided_slice %592 {offsets = [3, 0], sizes = [1, 128], strides = [1, 1]} : vector<8x128xf32> to vector<1x128xf32>
    %603 = vector.broadcast %602 : vector<1x128xf32> to vector<16x128xf32>
    %604 = arith.mulf %603, %577 : vector<16x128xf32>
    %605 = vector.extract_strided_slice %592 {offsets = [4, 0], sizes = [1, 128], strides = [1, 1]} : vector<8x128xf32> to vector<1x128xf32>
    %606 = vector.broadcast %605 : vector<1x128xf32> to vector<16x128xf32>
    %607 = arith.mulf %606, %577 : vector<16x128xf32>
    %608 = vector.extract_strided_slice %592 {offsets = [5, 0], sizes = [1, 128], strides = [1, 1]} : vector<8x128xf32> to vector<1x128xf32>
    %609 = vector.broadcast %608 : vector<1x128xf32> to vector<16x128xf32>
    %610 = arith.mulf %609, %577 : vector<16x128xf32>
    %611 = vector.extract_strided_slice %592 {offsets = [6, 0], sizes = [1, 128], strides = [1, 1]} : vector<8x128xf32> to vector<1x128xf32>
    %612 = vector.broadcast %611 : vector<1x128xf32> to vector<16x128xf32>
    %613 = arith.mulf %612, %577 : vector<16x128xf32>
    %614 = vector.extract_strided_slice %592 {offsets = [7, 0], sizes = [1, 128], strides = [1, 1]} : vector<8x128xf32> to vector<1x128xf32>
    %615 = vector.broadcast %614 : vector<1x128xf32> to vector<16x128xf32>
    %616 = arith.mulf %615, %577 : vector<16x128xf32>
    %617 = tpu.concatenate %595, %598, %601, %604, %607, %610, %613, %616 in 0 : vector<16x128xf32>, vector<16x128xf32>, vector<16x128xf32>, vector<16x128xf32>, vector<16x128xf32>, vector<16x128xf32>, vector<16x128xf32>, vector<16x128xf32> -> vector<128x128xf32>
    %618 = vector.extract_strided_slice %405 {offsets = [2, 0], sizes = [1, 128], strides = [1, 1]} : vector<3x128xf32> to vector<1x128xf32>
    %619 = vector.extract_strided_slice %407 {offsets = [2, 0], sizes = [1, 128], strides = [1, 1]} : vector<3x128xf32> to vector<1x128xf32>
    %620 = vector.extract_strided_slice %366 {offsets = [2, 0], sizes = [1, 128], strides = [1, 1]} : vector<3x128xf32> to vector<1x128xf32>
    %621 = tpu.concatenate %618, %619, %620, %417 in 0 : vector<1x128xf32>, vector<1x128xf32>, vector<1x128xf32>, vector<5x128xf32> -> vector<8x128xf32>
    %cst_140 = arith.constant dense<0.000000e+00> : vector<8x128xf32>
    %622 = tpu.matmul %621, %617, %cst_140 {dimension_numbers = #tpu.dot_dimension_numbers<[1], [0], [0], [1], [0, 0, 1, 1], [], []>} : vector<8x128xf32>, vector<128x128xf32>, vector<8x128xf32> -> vector<8x128xf32>
    %623 = vector.extract_strided_slice %622 {offsets = [0, 0], sizes = [1, 128], strides = [1, 1]} : vector<8x128xf32> to vector<1x128xf32>
    %624 = vector.extract_strided_slice %416 {offsets = [1, 0], sizes = [1, 128], strides = [1, 1]} : vector<16x128xf32> to vector<1x128xf32>
    %625 = arith.subf %623, %624 : vector<1x128xf32>
    %626 = vector.extract_strided_slice %622 {offsets = [1, 0], sizes = [1, 128], strides = [1, 1]} : vector<8x128xf32> to vector<1x128xf32>
    %627 = vector.extract_strided_slice %416 {offsets = [4, 0], sizes = [1, 128], strides = [1, 1]} : vector<16x128xf32> to vector<1x128xf32>
    %628 = arith.subf %626, %627 : vector<1x128xf32>
    %629 = vector.extract_strided_slice %622 {offsets = [2, 0], sizes = [1, 128], strides = [1, 1]} : vector<8x128xf32> to vector<1x128xf32>
    %630 = vector.extract_strided_slice %416 {offsets = [7, 0], sizes = [1, 128], strides = [1, 1]} : vector<16x128xf32> to vector<1x128xf32>
    %631 = arith.subf %629, %630 : vector<1x128xf32>
    %632 = arith.mulf %625, %625 : vector<1x128xf32>
    %633 = arith.mulf %628, %628 : vector<1x128xf32>
    %634 = arith.addf %632, %633 : vector<1x128xf32>
    %635 = arith.mulf %631, %631 : vector<1x128xf32>
    %636 = arith.addf %634, %635 : vector<1x128xf32>
    %cst_141 = arith.constant dense<0.000000e+00> : vector<1xf32>
    %637 = vector.multi_reduction <add>, %636, %cst_141 [1] : vector<1x128xf32> to vector<1xf32>
    %638 = vector.shape_cast %637 : vector<1xf32> to vector<1x1xf32>
    %cst_142 = arith.constant 0.00260416674 : f32
    %639 = vector.broadcast %cst_142 : f32 to vector<1x1xf32>
    %640 = arith.mulf %638, %639 : vector<1x1xf32>
    %641 = math.sqrt %640 : vector<1x1xf32>
    %642 = arith.addf %530, %641 : vector<1x1xf32>
    %643 = arith.addf %642, %316 : vector<1x1xf32>
    %644 = arith.addf %643, %358 : vector<1x1xf32>
    %cst_143 = arith.constant 5.000000e-01 : f32
    %645 = vector.broadcast %cst_143 : f32 to vector<1x1xf32>
    %646 = arith.mulf %644, %645 : vector<1x1xf32>
    %c0_144 = arith.constant 0 : index
    %c0_145 = arith.constant 0 : index
    %647 = vector.load %arg5[%c0_144, %c0_145] : memref<1x1xf32, #tpu.memory_space<vmem>>, vector<1x1xf32>
    tpu.vector_store %arg5[%c0_144, %c0_145], %646 {strides = array<i32>} : memref<1x1xf32, #tpu.memory_space<vmem>>, vector<1x1xf32>,
    return
  }
}

</mosaic_0001>

<bundles_post_ra>
// kernel: tpu_custom_call.1
= control target key start
LH: loop header
LB: loop body
LE: loop exit
PB: predicated region body
PF: predicated region fallthrough
CT: control target
= control target key end

     0   :  { %13 = vsyncpa [#allocation3], 0  ;;  %s2121_s0 = inlined_call_operand.vmem [shape: f32[2,2,128], index: 0, kind: input, shape index: {}]   ;;  %s2122_s1 = inlined_call_operand.vmem [shape: f32[2,128], index: 1, kind: input, shape index: {}]   ;;  %s2123_s2 = inlined_call_operand.hbm [shape: f32[128,128], index: 2, kind: input, shape index: {}]   ;;  %s2124_s3 = inlined_call_operand.vmem [shape: f32[24,2,1], index: 3, kind: input, shape index: {}]   ;;  %s2125_s4 = inlined_call_operand.vmem [shape: f32[8], index: 4, kind: input, shape index: {}]   ;;  %s2126_s5 = inlined_call_operand.hbm [shape: f32[1,1], index: 5, kind: output, shape index: {0}]   ;;  %s2127_s6 = inlined_call_operand.hbm [shape: f32[3,128], index: 6, kind: output, shape index: {1}]   ;;  %s2128_s7 = inlined_call_operand.hbm [shape: f32[9,128], index: 7, kind: output, shape index: {2}]  }
   0x1   :  { %14 = vsyncpa [#allocation5], 0 }
   0x2   :  { %15 = vsyncpa [#allocation4], 0 }
   0x3   :  { %16 = vsyncpa [#allocation9], 0  ;;  %s1481_s24 = smov [#allocation2]   ;;  %s41_s28 = sshll.u32 %s2125_s4, 4  ;;  %s42_s28 = int_to_ptr.vmem [resolvable:$true] %s41_s28 }
   0x4   :  { %s26_s25 = sshll.u32 %s1481_s24, 4  ;;  %s27_s25 = int_to_ptr.vmem [resolvable:$true] %s26_s25 }
   0x5   :  { %s1389_s29 = scalar_lea.vmem %s27_s25, 2048  ;;  %p1394_p1 = scmp.lt.s32.totalorder %s27_s25, %s27_s25 }
   0x6   :  { %p1390_p0 = scmp.ne.s32.totalorder %s27_s25, %s1389_s29  ;;  %p1395_p2 = scmp.lt.s32.totalorder %s1389_s29, %s1389_s29 }
   0x8   :  { %p1396_p3 = por %p1395_p2, %p1394_p1 }
   0xa   :  { %p1397_p4 = pnand %p1396_p3, %p1390_p0 }
   0xc   :  { %1400 = shalt.err (!%p1397_p4)
}
   0xd   :  { %s1482_s30 = smov 128   ;;  %s1483_s8 = smov 8  }
   0xe   :  { %32 = dma.hbm_to_vmem [thread:$0]  %s2123_s2, 2048, %s27_s25, [#allocation3], %s1482_s30, %s1482_s30, %s1483_s8  }
   0xf   :  { %s1401_s11 = scalar_lea.vmem %s42_s28, 16  ;;  %p1406_p6 = scmp.lt.s32.totalorder %s42_s28, %s42_s28 }
  0x10   :  { %p1402_p5 = scmp.ne.s32.totalorder %s42_s28, %s1401_s11  ;;  %p1407_p7 = scmp.lt.s32.totalorder %s1401_s11, %s1401_s11 }
  0x12   :  { %p1408_p8 = por %p1407_p7, %p1406_p6 }
  0x14   :  { %p1409_p9 = pnand %p1408_p8, %p1402_p5 }
  0x16   :  { %1412 = shalt.err (!%p1409_p9)
}
  0x17   :  { %s1484_s4 = smov [#allocation6]  }
  0x18   :  { %44 = dma.vmem_to_smem %s42_s28, 16, %s1484_s4, [#allocation5]  }
  0x19   :  { %1473 = dma.done.wait [#allocation3], 2048  }
  0x1a   :  { %1474 = vsyncadd [#allocation3], 4294965248 }
  0x1b   :  { %1475 = dma.done.wait [#allocation5], 16  }
  0x1c   :  { %1476 = vsyncadd [#allocation5], 4294967280 }
  0x1d   :  { %51 = sfence }
  0x1e   :  { %v1161_v0 = vld [vmem:[%s2124_s3 + $0x10] sm:$0x3]  ;;  %v1159_v1 = vld [vmem:[%s2124_s3 + $0xc] sm:$0x3]  ;;  %v1485_v2 = vmov 0   ;;  %v79_v5 = vlaneseq  ;;  %s52_s23 = sld [smem:[#allocation6]] }
  0x1f   :  { %1358 = vset.pattern.permute.xlu1 %v1485_v2  ;;  %1357 = vset.pattern.permute.xlu0 %v1485_v2  ;;  %v1160_v3 = vld [vmem:[%s2124_s3 + $0xe] sm:$0x3]  ;;  %v93_v4 = vld [vmem:[%s2124_s3] sm:$0x3]  ;;  %v1154_v6 = vld [vmem:[%s2124_s3 + $0x2] sm:$0x3] }
  0x20   :  { %170 = vperm.xlu1 %1358, %v1161_v0   ;;  %146 = vperm.xlu0 %1357, %v1159_v1   ;;  %v1155_v7 = vld [vmem:[%s2124_s3 + $0x4] sm:$0x3]  ;;  %s1146_s24 = sld [smem:[#allocation6 + $0x1]]  ;;  %v1558_v8 = vshrl.u32 %v79_v5, 7  ;;  %v1156_v9 = vld [vmem:[%s2124_s3 + $0x6] sm:$0x3] }
  0x21   :  { %v1157_v10 = vld [vmem:[%s2124_s3 + $0x8] sm:$0x3]  ;;  %v1572_v12 = vld [vmem:[%s2122_s1] sm:$0x1]  ;;  %v1580_v14 = vld [vmem:[%s2122_s1 + $0x1] sm:$0x1] }
  0x22   :  { %v1567_v11 = vsub.s32 0, %v1558_v8  ;;  %v76_v13 = vld [vmem:[%s2121_s0] sm:$0x3]  ;;  %v1153_v16 = vld [vmem:[%s2121_s0 + $0x2] sm:$0x3]  ;;  %v1624_v46 = vsub.s32 1, %v1558_v8 }
  0x23   :  { %v1158_v19 = vld [vmem:[%s2124_s3 + $0xa] sm:$0x3]  ;;  %v1171_v20 = vld [vmem:[%s2124_s3 + $0x24] sm:$0x3]  ;;  %v1172_v26 = vld [vmem:[%s2124_s3 + $0x26] sm:$0x3] }
  0x24   :  { %158 = vperm.xlu0 %1357, %v1160_v3   ;;  %152 = vperm.xlu1 %1358, %v93_v4   ;;  %v82_v15 = vrot.slane %v1572_v12, %v1567_v11  ;;  %v87_v17 = vrot.slane %v1580_v14, %v1567_v11  ;;  %v60_v18 = vstv %s52_s23  ;;  %v1173_v27 = vld [vmem:[%s2124_s3 + $0x28] sm:$0x3]  ;;  %v1165_v32 = vld [vmem:[%s2124_s3 + $0x18] sm:$0x3]  ;;  %v1166_v33 = vld [vmem:[%s2124_s3 + $0x1a] sm:$0x3] }
  0x25   :  { %1359 = vrcp.f32 %v60_v18  ;;  %v1167_v38 = vld [vmem:[%s2124_s3 + $0x1c] sm:$0x3]  ;;  %v1168_v39 = vld [vmem:[%s2124_s3 + $0x1e] sm:$0x3]  ;;  %v1169_v49 = vld [vmem:[%s2124_s3 + $0x20] sm:$0x3] }
  0x26   :  { %v63_v21 = vstv %s1146_s24  ;;  %v1595_v22 = vadd.f32 %v82_v15, %v76_v13  ;;  %v1597_v23 = vadd.f32 %v1153_v16, %v87_v17  ;;  %v1170_v50 = vld [vmem:[%s2124_s3 + $0x22] sm:$0x3]  ;;  %v1641_v54 = vadd.s32 8, %v1558_v8  ;;  %v1164_v57 = vld [vmem:[%s2124_s3 + $0x16] sm:$0x3]  ;;  %s1695_s19 = sld [smem:[#allocation6 + $0x2]] }
  0x27   :  { %1361 = vrcp.f32 %v63_v21  ;;  %v1162_v60 = vld [vmem:[%s2124_s3 + $0x12] sm:$0x3]  ;;  %v1163_v5 = vld [vmem:[%s2124_s3 + $0x14] sm:$0x3]  ;;  %v1174_v17 = vld [vmem:[%s2124_s3 + $0x2a] sm:$0x3] }
  0x28   :  { %164 = vperm.xlu0 %1357, %v1154_v6   ;;  %176 = vperm.xlu1 %1358, %v1155_v7   ;;  %v666_v24 = vmul.f32 1.0666667, %v1595_v22  ;;  %v670_v25 = vmul.f32 1.1428572, %v1597_v23  ;;  %v1176_v6 = vld [vmem:[%s2124_s3 + $0x2e] sm:$0x3] }
  0x29   :  { %v1175_v18 = vld [vmem:[%s2124_s3 + $0x2c] sm:$0x3]  ;;  %s1697_s20 = sld [smem:[#allocation6 + $0x3]]  ;;  %vm423_vm8 = vcmask 1041408   ;;  %vm461_vm9 = vcmask 1040384   ;;  %vm468_vm10 = vcmask 1042432  }
  0x2a   :  { %v1178_v28 = vadd.f32 -0.5, %v666_v24  ;;  %v1179_v29 = vadd.f32 -0.5, %v670_v25  ;;  %s1699_s21 = sld [smem:[#allocation6 + $0x6]]  ;;  %s1488_s28 = smov [#allocation8]  }
  0x2b   :  { %s1701_s22 = sld [smem:[#allocation6 + $0x7]]  ;;  %s1117_s29 = sshll.u32 %s1488_s28, 4  ;;  %s1118_s29 = int_to_ptr.vmem [resolvable:$true] %s1117_s29 }
  0x2c   :  { %199 = vperm.xlu0 %1357, %v1156_v9   ;;  %206 = vperm.xlu1 %1358, %v1157_v10   ;;  %v668_v30 = vmax.f32 %v1178_v28, 0.0  ;;  %v672_v31 = vmax.f32 %v1179_v29, 0.0  ;;  %v68_v21 = vstv %s1695_s19  ;;  %s1149_s3 = sld [smem:[#allocation6 + $0x4]]  ;;  %s1413_s9 = scalar_lea.vmem %s1118_s29, 64 }
  0x2d   :  { %v69_v25 = vsub.f32 %v1572_v12, %v68_v21  ;;  %s1150_s24 = sld [smem:[#allocation6 + $0x5]]  ;;  %p1414_p10 = scmp.ne.s32.totalorder %s1118_s29, %s1413_s9 }
  0x2e   :  { %v669_v34 = vmin.f32 %v668_v30, 15.0  ;;  %v673_v35 = vmin.f32 %v672_v31, 7.0  ;;  %p1418_p11 = scmp.lt.s32.totalorder %s1118_s29, %s1118_s29  ;;  %p1419_p12 = scmp.lt.s32.totalorder %s1413_s9, %s1413_s9 }
  0x2f   :  { %v72_v24 = vstv %s1697_s20 }
  0x30   :  { %213 = vperm.xlu0 %1357, %v1158_v19   ;;  %226 = vperm.xlu1 %1358, %v1171_v20   ;;  %v674_v36 = vfloor.f32 %v669_v34  ;;  %v675_v37 = vfloor.f32 %v673_v35  ;;  %s527_s23 = smul.f32 2.0, %s1699_s21  ;;  %p1420_p13 = por %p1419_p12, %p1418_p11 }
  0x31   :  { %s539_s25 = smul.f32 2.0, %s1701_s22 }
  0x32   :  { %v1619_v40 = vsub.f32 %v669_v34, %v674_v36  ;;  %v1343_v41 = vtrunc.f32 %v674_v36  ;;  %v1360_v42 = vpop.eup %1359  ;;  %v1345_v43 = vtrunc.f32 %v675_v37  ;;  %v1638_v53 = vsub.f32 %v673_v35, %v675_v37  ;;  %p1421_p0 = pnand %p1420_p13, %p1414_p10 }
  0x33   :  { %1339 = vpush %v1360_v42  ;;  %v528_v28 = vstv %s527_s23  ;;  %v540_v31 = vstv %s539_s25  ;;  %v519_v37 = vstv %s1149_s3 }
  0x34   :  { %238 = vperm.xlu0 %1357, %v1172_v26   ;;  %250 = vperm.xlu1 %1358, %v1173_v27   ;;  %v1362_v44 = vpop.eup %1361  ;;  %v1621_v45 = vcvt.f32.s32 %v1343_v41  ;;  %v2129_v47 = vsub.f32 1.0, %v1619_v40  ;;  %v1627_v48 = vcvt.f32.s32 %v1345_v43  ;;  %v913_v59 = vrot.slane %v1619_v40, %v1624_v46 }
  0x35   :  { %1341 = vpush %v1362_v44  ;;  %v2130_v0 = vsub.f32 1.0, %v1638_v53  ;;  %v936_v13 = vrot.slane %v1638_v53, %v1624_v46  ;;  %v73_v26 = vsub.f32 %v1580_v14, %v72_v24 }
  0x36   :  { %v680_v51 = vadd.s32 1, %v1621_v45  ;;  %v895_v52 = vrot.slane %v1621_v45, %v1624_v46  ;;  %v901_v55 = vrot.slane %v2129_v47, %v1624_v46  ;;  %v683_v56 = vadd.s32 1, %v1627_v48 }
  0x37   :  { %v921_v1 = vrot.slane %v1627_v48, %v1624_v46  ;;  %v926_v2 = vrot.slane %v2130_v0, %v1624_v46 }
  0x38   :  { %232 = vperm.xlu0 %1357, %v1165_v32   ;;  %244 = vperm.xlu1 %1358, %v1166_v33   ;;  %vm681_vm0 = vcmp.lt.s32.totalorder %v680_v51, 15  ;;  %vm896_vm1 = vcmp.eq.s32.totalorder %v1558_v8, %v895_v52  ;;  %vm897_vm2 = vcmp.eq.s32.totalorder %v1641_v54, %v895_v52  ;;  %vm684_vm5 = vcmp.lt.s32.totalorder %v683_v56, 7 }
  0x39   :  { %v1651_v58 = vsel %vm681_vm0, %v680_v51, 15  ;;  %v902_v61 = vsel %vm896_vm1, %v901_v55, 0.0  ;;  %v903_v62 = vsel %vm897_vm2, %v901_v55, 0.0  ;;  %v1679_v10 = vsel %vm684_vm5, %v683_v56, 7 }
  0x3a   :  { %v907_v63 = vrot.slane %v1651_v58, %v1624_v46  ;;  %vm922_vm6 = vcmp.eq.s32.totalorder %v1558_v8, %v921_v1  ;;  %v931_v16 = vrot.slane %v1679_v10, %v1624_v46  ;;  %vm1487_vm1 = vmmov 0  }
  0x3b   :  { %v927_v15 = vsel %vm922_vm6, %v926_v2, 0.0  ;;  %vm568_vm2 = vcmask 1045504  }
  0x3c   :  { %256 = vperm.xlu0 %1357, %v1167_v38   ;;  %275 = vperm.xlu1 %1358, %v1168_v39   ;;  %vm908_vm3 = vcmp.eq.s32.totalorder %v1558_v8, %v907_v63  ;;  %vm909_vm4 = vcmp.eq.s32.totalorder %v1641_v54, %v907_v63  ;;  %vm932_vm7 = vcmp.eq.s32.totalorder %v1558_v8, %v931_v16  ;;  %v522_v38 = vstv %s1150_s24 }
  0x3d   :  { %v914_v3 = vsel %vm908_vm3, %v913_v59, 0.0  ;;  %v915_v4 = vsel %vm909_vm4, %v913_v59, 0.0  ;;  %v937_v19 = vsel %vm932_vm7, %v936_v13, 0.0  ;;  %v547_v59 = vstv %s1699_s21 }
  0x3e   :  { %v1675_v7 = vadd.f32 %v914_v3, %v902_v61  ;;  %v1677_v9 = vadd.f32 %v915_v4, %v903_v62  ;;  %v1693_v20 = vadd.f32 %v937_v19, %v927_v15  ;;  %vm472_vm3 = vcmask 1043456  }
  0x40   :  { %282 = vperm.xlu0 %1357, %v1169_v49   ;;  %289 = vperm.xlu1 %1358, %v1170_v50   ;;  %2132 = vst [vmem:[#allocation15_spill] sm:$0xff] %v1675_v7 }
  0x44   :  { %182 = vperm.xlu0 %1357, %v1164_v57   ;;  %188 = vperm.xlu1 %1358, %v1162_v60   ;;  %v535_v57 = vstv %s1701_s22 }
  0x48   :  { %220 = vperm.xlu0 %1357, %v1163_v5   ;;  %262 = vperm.xlu1 %1358, %v1176_v6  }
  0x4c   :  { %268 = vperm.xlu0 %1357, %v1174_v17   ;;  %296 = vperm.xlu1 %1358, %v1175_v18  }
  0x64   :  { %s1711_s26 = spop %1339 }
  0x65   :  { %v70_v27 = vstv %s1711_s26 }
  0x66   :  { %s1714_s27 = spop %1341  ;;  %v71_v29 = vmul.f32 %v70_v27, %v69_v25 }
  0x67   :  { %v74_v30 = vstv %s1714_s27 }
  0x68   :  { %v75_v32 = vmul.f32 %v74_v30, %v73_v26  ;;  %v516_v12 = vmul.f32 %v71_v29, %v71_v29  ;;  %v529_v33 = vmul.f32 %v528_v28, %v71_v29  ;;  %v532_v34 = vmul.f32 2.0, %v71_v29 }
  0x69   :  { %v541_v14 = vmul.f32 %v540_v31, %v71_v29  ;;  %v89_v26 = vsub.f32 %v1595_v22, %v68_v21  ;;  %v91_v22 = vsub.f32 %v1597_v23, %v72_v24 }
  0x6a   :  { %v517_v35 = vmul.f32 %v75_v32, %v75_v32  ;;  %v544_v36 = vmul.f32 2.0, %v75_v32  ;;  %v530_v39 = vmul.f32 %v529_v33, %v75_v32  ;;  %v533_v41 = vmul.f32 %v532_v34, %v71_v29 }
  0x6b   :  { %v542_v43 = vmul.f32 %v541_v14, %v75_v32  ;;  %v1731_v28 = vrot.slane %v75_v32, %v1567_v11  ;;  %v1736_v33 = vrot.slane %v71_v29, %v1567_v11  ;;  %v1738_v34 = vmul.f32 %v89_v26, %v70_v27 }
  0x6c   :  { %v518_v42 = vadd.f32 %v517_v35, %v516_v12  ;;  %v545_v44 = vmul.f32 %v544_v36, %v75_v32 }
  0x6e   :  { %v520_v49 = vmul.f32 %v519_v37, %v518_v42  ;;  %v523_v50 = vmul.f32 %v522_v38, %v518_v42  ;;  %v534_v51 = vadd.f32 %v533_v41, %v518_v42  ;;  %v546_v52 = vadd.f32 %v545_v44, %v518_v42 }
  0x70   :  { %v521_v55 = vadd.f32 1.0, %v520_v49  ;;  %v524_v56 = vmul.f32 %v523_v50, %v518_v42  ;;  %v536_v62 = vmul.f32 %v535_v57, %v534_v51  ;;  %v548_v1 = vmul.f32 %v547_v59, %v546_v52 }
  0x71   :  { %v1771_v51 = vmul.f32 %v91_v22, %v74_v30 }
  0x72   :  { %v525_v60 = vadd.f32 %v524_v56, %v521_v55 }
  0x74   :  { %v526_v61 = vmul.f32 %v525_v60, %v71_v29  ;;  %v538_v63 = vmul.f32 %v525_v60, %v75_v32 }
  0x76   :  { %v531_v2 = vadd.f32 %v530_v39, %v526_v61  ;;  %v543_v3 = vadd.f32 %v542_v43, %v538_v63 }
  0x78   :  { %v1721_v4 = vadd.f32 %v536_v62, %v531_v2  ;;  %v1723_v5 = vadd.f32 %v548_v1, %v543_v3 }
  0x7a   :  { %2133 = vst [vmem:[#allocation16_spill] sm:$0xff] %v1721_v4  ;;  %2134 = vst [vmem:[#allocation17_spill] sm:$0xff] %v1723_v5 }
  0x9b   :  { %v1725_v6 = vpop.permute.xlu1 %170  ;;  %v147_v13 = vpop.permute.xlu0 %146 }
  0x9c   :  { %v196_v35 = vmul.f32 %v1731_v28, %v147_v13  ;;  %v149_v21 = vmul.f32 %v147_v13, %v1736_v33  ;;  %v173_v29 = vmul.f32 %v1725_v6, %v1736_v33  ;;  %v210_v27 = vmul.f32 %v1731_v28, %v1725_v6 }
  0x9f   :  { %v159_v15 = vpop.permute.xlu0 %158  ;;  %v153_v16 = vpop.permute.xlu1 %152 }
  0xa0   :  { %v203_v14 = vmul.f32 %v1731_v28, %v159_v15  ;;  %v161_v32 = vmul.f32 %v159_v15, %v1736_v33  ;;  %v1757_v41 = vsub.f32 %v149_v21, %v153_v16 }
  0xa2   :  { %v300_v57 = vmul.f32 %v1757_v41, %v1757_v41 }
  0xa3   :  { %v165_v17 = vpop.permute.xlu0 %164  ;;  %v1727_v18 = vpop.permute.xlu1 %176 }
  0xa4   :  { %v1759_v42 = vsub.f32 %v161_v32, %v165_v17  ;;  %v1762_v23 = vsub.f32 %v173_v29, %v1727_v18 }
  0xa6   :  { %v301_v59 = vmul.f32 %v1759_v42, %v1757_v41  ;;  %v303_v60 = vmul.f32 %v1759_v42, %v1759_v42  ;;  %v302_v61 = vmul.f32 %v1762_v23, %v1757_v41  ;;  %v304_v62 = vmul.f32 %v1762_v23, %v1759_v42 }
  0xa7   :  { %v200_v19 = vpop.permute.xlu0 %199  ;;  %v207_v25 = vpop.permute.xlu1 %206  ;;  %v305_v13 = vmul.f32 %v1762_v23, %v1762_v23 }
  0xa8   :  { %v1753_v38 = vsub.f32 %v196_v35, %v200_v19  ;;  %v1755_v39 = vsub.f32 %v203_v14, %v207_v25 }
  0xaa   :  { %v310_v52 = vmul.f32 %v1755_v39, %v1753_v38  ;;  %v312_v63 = vmul.f32 %v1755_v39, %v1755_v39  ;;  %v309_v19 = vmul.f32 %v1753_v38, %v1753_v38 }
  0xab   :  { %v1733_v31 = vpop.permute.xlu0 %213  ;;  %v227_v12 = vpop.permute.xlu1 %226 }
  0xac   :  { %v1765_v24 = vsub.f32 %v210_v27, %v1733_v31  ;;  %v229_v43 = vmul.f32 %v227_v12, %v1738_v34  ;;  %v319_v25 = vadd.f32 %v310_v52, %v301_v59  ;;  %v272_v14 = vmul.f32 %v227_v12, %v1771_v51 }
  0xad   :  { %v321_v29 = vadd.f32 %v312_v63, %v303_v60 }
  0xae   :  { %v311_v1 = vmul.f32 %v1765_v24, %v1753_v38  ;;  %v313_v15 = vmul.f32 %v1765_v24, %v1755_v39  ;;  %v314_v16 = vmul.f32 %v1765_v24, %v1765_v24 }
  0xaf   :  { %v239_v36 = vpop.permute.xlu0 %238  ;;  %v1742_v37 = vpop.permute.xlu1 %250 }
  0xb0   :  { %v241_v44 = vmul.f32 %v239_v36, %v1738_v34  ;;  %v253_v30 = vmul.f32 %v1742_v37, %v1738_v34  ;;  %v279_v22 = vmul.f32 %v239_v36, %v1771_v51  ;;  %v320_v27 = vadd.f32 %v311_v1, %v302_v61 }
  0xb1   :  { %v322_v12 = vadd.f32 %v313_v15, %v304_v62  ;;  %v323_v52 = vadd.f32 %v314_v16, %v305_v13 }
  0xb3   :  { %v233_v49 = vpop.permute.xlu0 %232  ;;  %v245_v50 = vpop.permute.xlu1 %244 }
  0xb4   :  { %v1775_v55 = vsub.f32 %v229_v43, %v233_v49  ;;  %v1777_v56 = vsub.f32 %v241_v44, %v245_v50  ;;  %v286_v43 = vmul.f32 %v1742_v37, %v1771_v51 }
  0xb6   :  { %v328_v26 = vmul.f32 %v1777_v56, %v1775_v55  ;;  %v330_v35 = vmul.f32 %v1777_v56, %v1777_v56 }
  0xb7   :  { %v1795_v2 = vpop.permute.xlu0 %256  ;;  %v276_v3 = vpop.permute.xlu1 %275 }
  0xb8   :  { %v1804_v17 = vsub.f32 %v253_v30, %v1795_v2  ;;  %v1824_v36 = vsub.f32 %v272_v14, %v276_v3  ;;  %v327_v30 = vmul.f32 %v1775_v55, %v1775_v55  ;;  %v337_v60 = vadd.f32 %v328_v26, %v319_v25 }
  0xb9   :  { %v339_v61 = vadd.f32 %v330_v35, %v321_v29  ;;  %v318_v35 = vadd.f32 %v309_v19, %v300_v57 }
  0xba   :  { %v329_v21 = vmul.f32 %v1804_v17, %v1775_v55  ;;  %v331_v32 = vmul.f32 %v1804_v17, %v1777_v56  ;;  %v332_v44 = vmul.f32 %v1804_v17, %v1804_v17 }
  0xbb   :  { %v283_v49 = vpop.permute.xlu0 %282  ;;  %v1822_v50 = vpop.permute.xlu1 %289 }
  0xbc   :  { %v1826_v59 = vsub.f32 %v279_v22, %v283_v49  ;;  %v1831_v63 = vsub.f32 %v286_v43, %v1822_v50  ;;  %v338_v1 = vadd.f32 %v329_v21, %v320_v27  ;;  %v340_v47 = vadd.f32 %v331_v32, %v322_v12 }
  0xbd   :  { %v341_v3 = vadd.f32 %v332_v44, %v323_v52  ;;  %v345_v21 = vmul.f32 %v1824_v36, %v1824_v36  ;;  %v336_v43 = vadd.f32 %v327_v30, %v318_v35 }
  0xbe   :  { %v346_v0 = vmul.f32 %v1826_v59, %v1824_v36  ;;  %v348_v62 = vmul.f32 %v1826_v59, %v1826_v59  ;;  %v347_v13 = vmul.f32 %v1831_v63, %v1824_v36  ;;  %v349_v15 = vmul.f32 %v1831_v63, %v1826_v59 }
  0xbf   :  { %v350_v16 = vmul.f32 %v1831_v63, %v1831_v63  ;;  %v1843_v25 = vpop.permute.xlu0 %182  ;;  %v189_v26 = vpop.permute.xlu1 %188 }
  0xc0   :  { %v1845_v14 = vadd.f32 %v346_v0, %v337_v60  ;;  %v357_v22 = vadd.f32 %v348_v62, %v339_v61  ;;  %v356_v32 = vadd.f32 %v347_v13, %v338_v1  ;;  %v358_v29 = vadd.f32 %v349_v15, %v340_v47 }
  0xc1   :  { %v359_v27 = vadd.f32 %v350_v16, %v341_v3  ;;  %v185_v44 = vmul.f32 %v1843_v25, %v1736_v33  ;;  %v217_v19 = vmul.f32 %v1731_v28, %v1843_v25  ;;  %v354_v60 = vadd.f32 %v345_v21, %v336_v43 }
  0xc2   :  { %v364_v5 = vmul.f32 %v358_v29, %v358_v29  ;;  %v368_v0 = vmul.f32 %v358_v29, %v356_v32  ;;  %v372_v33 = vmul.f32 %v358_v29, %v1845_v14  ;;  %v373_v16 = vmul.f32 %v357_v22, %v356_v32 }
  0xc3   :  { %v221_v49 = vpop.permute.xlu0 %220  ;;  %v1851_v12 = vpop.permute.xlu1 %262  ;;  %v363_v52 = vmul.f32 %v359_v27, %v357_v22  ;;  %v367_v57 = vmul.f32 %v359_v27, %v1845_v14  ;;  %v191_v62 = vsub.f32 %v189_v26, %v185_v44 }
  0xc4   :  { %v223_v47 = vsub.f32 %v221_v49, %v217_v19  ;;  %v265_v30 = vmul.f32 %v1851_v12, %v1738_v34  ;;  %v374_v7 = vsub.f32 %v372_v33, %v373_v16 }
  0xc5   :  { %v365_v61 = vsub.f32 %v363_v52, %v364_v5  ;;  %v369_v1 = vsub.f32 %v367_v57, %v368_v0  ;;  %v306_v21 = vmul.f32 %v191_v62, %v1757_v41  ;;  %v307_v34 = vmul.f32 %v191_v62, %v1759_v42 }
  0xc6   :  { %v315_v28 = vmul.f32 %v223_v47, %v1753_v38  ;;  %v316_v5 = vmul.f32 %v223_v47, %v1755_v39  ;;  %v375_v49 = vmul.f32 %v374_v7, %v356_v32  ;;  %v293_v52 = vmul.f32 %v1851_v12, %v1771_v51 }
  0xc7   :  { %v269_v3 = vpop.permute.xlu0 %268  ;;  %v366_v13 = vmul.f32 %v365_v61, %v354_v60  ;;  %v370_v15 = vmul.f32 %v369_v1, %v1845_v14  ;;  %v297_v43 = vpop.permute.xlu1 %296  ;;  %v317_v41 = vmul.f32 %v223_v47, %v1765_v24  ;;  %v386_v51 = vmul.f32 %v358_v29, %v354_v60 }
  0xc8   :  { %v271_v35 = vsub.f32 %v269_v3, %v265_v30  ;;  %v324_v1 = vadd.f32 %v315_v28, %v306_v21  ;;  %v325_v30 = vadd.f32 %v316_v5, %v307_v34  ;;  %v299_v33 = vsub.f32 %v297_v43, %v293_v52 }
  0xc9   :  { %v371_v4 = vsub.f32 %v366_v13, %v370_v15  ;;  %v308_v3 = vmul.f32 %v191_v62, %v1762_v23  ;;  %v382_v13 = vmul.f32 %v359_v27, %v354_v60  ;;  %v383_v15 = vmul.f32 %v356_v32, %v356_v32 }
  0xca   :  { %v333_v26 = vmul.f32 %v271_v35, %v1775_v55  ;;  %v334_v44 = vmul.f32 %v271_v35, %v1777_v56  ;;  %v351_v42 = vmul.f32 %v299_v33, %v1824_v36  ;;  %v352_v55 = vmul.f32 %v299_v33, %v1826_v59 }
  0xcb   :  { %v376_v19 = vadd.f32 %v375_v49, %v371_v4  ;;  %v335_v56 = vmul.f32 %v271_v35, %v1804_v17  ;;  %v385_v4 = vmul.f32 %v356_v32, %v1845_v14  ;;  %v326_v5 = vadd.f32 %v317_v41, %v308_v3 }
  0xcc   :  { %v342_v38 = vadd.f32 %v333_v26, %v324_v1  ;;  %v343_v39 = vadd.f32 %v334_v44, %v325_v30  ;;  %v381_v21 = vsub.f32 %v368_v0, %v367_v57  ;;  %v388_v43 = vmul.f32 %v357_v22, %v354_v60 }
  0xcd   :  { %1363 = vrcp.f32 %v376_v19  ;;  %v344_v49 = vadd.f32 %v335_v56, %v326_v5  ;;  %v384_v24 = vsub.f32 %v382_v13, %v383_v15  ;;  %v387_v47 = vsub.f32 %v385_v4, %v386_v51 }
  0xce   :  { %v360_v16 = vadd.f32 %v351_v42, %v342_v38  ;;  %v361_v28 = vadd.f32 %v352_v55, %v343_v39  ;;  %v353_v23 = vmul.f32 %v299_v33, %v1831_v63  ;;  %v389_v36 = vmul.f32 %v1845_v14, %v1845_v14 }
  0xd0   :  { %v391_v59 = vmul.f32 %v365_v61, %v360_v16  ;;  %v392_v27 = vmul.f32 %v381_v21, %v361_v28  ;;  %v397_v17 = vmul.f32 %v381_v21, %v360_v16  ;;  %v398_v62 = vmul.f32 %v384_v24, %v361_v28 }
  0xd1   :  { %v403_v35 = vmul.f32 %v374_v7, %v360_v16  ;;  %v404_v32 = vmul.f32 %v387_v47, %v361_v28  ;;  %v362_v29 = vadd.f32 %v353_v23, %v344_v49  ;;  %v390_v26 = vsub.f32 %v388_v43, %v389_v36 }
  0xd2   :  { %v393_v44 = vadd.f32 %v392_v27, %v391_v59  ;;  %v399_v57 = vadd.f32 %v398_v62, %v397_v17  ;;  %v716_v27 = vrot.slane %v1627_v48, %v1567_v11  ;;  %v727_v17 = vrot.slane %v1679_v10, %v1567_v11 }
  0xd3   :  { %v405_v22 = vadd.f32 %v404_v32, %v403_v35  ;;  %v394_v60 = vmul.f32 %v374_v7, %v362_v29  ;;  %v400_v52 = vmul.f32 %v387_v47, %v362_v29  ;;  %v406_v1 = vmul.f32 %v390_v26, %v362_v29 }
  0xd4   :  { %v689_v62 = vrot.slane %v1621_v45, %v1567_v11  ;;  %v702_v35 = vrot.slane %v1651_v58, %v1567_v11  ;;  %v2135_v29 = vsub.f32 1.0, %v1638_v53  ;;  %v732_v26 = vrot.slane %v1638_v53, %v1567_v11 }
  0xd5   :  { %v395_v30 = vadd.f32 %v394_v60, %v393_v44  ;;  %v401_v33 = vadd.f32 %v400_v52, %v399_v57  ;;  %v407_v14 = vadd.f32 %v406_v1, %v405_v22  ;;  %vm717_vm11 = vcmp.eq.s32.totalorder %v1558_v8, %v716_v27 }
  0xd6   :  { %vm728_vm12 = vcmp.eq.s32.totalorder %v1558_v8, %v727_v17  ;;  %v2136_v45 = vsub.f32 1.0, %v1619_v40  ;;  %v708_v58 = vrot.slane %v1619_v40, %v1567_v11  ;;  %vm691_vm13 = vcmp.eq.s32.totalorder %v1641_v54, %v689_v62  ;;  %v581_v17 = vld [vmem:[#allocation2 + $0x28] sm:$0xff] }
  0xd7   :  { %vm704_vm14 = vcmp.eq.s32.totalorder %v1641_v54, %v702_v35  ;;  %v733_v44 = vsel %vm728_vm12, %v732_v26, 0.0  ;;  %vm690_vm15 = vcmp.eq.s32.totalorder %v1558_v8, %v689_v62  ;;  %vm703_vm0 = vcmp.eq.s32.totalorder %v1558_v8, %v702_v35  ;;  %v580_v35 = vld [vmem:[#allocation2 + $0x20] sm:$0xff] }
  0xd8   :  { %v696_v48 = vrot.slane %v2136_v45, %v1567_v11  ;;  %v710_v57 = vsel %vm704_vm14, %v708_v58, 0.0  ;;  %v709_v60 = vsel %vm703_vm0, %v708_v58, 0.0  ;;  %v779_v40 = vsub.s32 7, %v1558_v8 }
  0xda   :  { %v1364_v34 = vpop.eup %1363  ;;  %v698_v53 = vsel %vm691_vm13, %v696_v48, 0.0  ;;  %v984_v27 = vrot.slane %v1693_v20, %v779_v40 }
  0xdb   :  { %v378_v0 = vmul.f32 %v1364_v34, %v376_v19  ;;  %v1942_v52 = vadd.f32 %v710_v57, %v698_v53  ;;  %v576_v57 = vld [vmem:[#allocation2] sm:$0xff] }
  0xdc   :  { %v2007_v53 = vmul.f32 %v984_v27, %v1677_v9 }
  0xdd   :  { %v379_v63 = vsub.f32 2.0, %v378_v0  ;;  %v697_v0 = vsel %vm690_vm15, %v696_v48, 0.0  ;;  %v578_v48 = vld [vmem:[#allocation2 + $0x10] sm:$0xff] }
  0xde   :  { %v1945_v1 = vadd.f32 %v709_v60, %v697_v0  ;;  %v2137_v0 = vld [vmem:[#allocation15_spill] sm:$0xff] }
  0xdf   :  { %v380_v61 = vmul.f32 %v1364_v34, %v379_v63  ;;  %v722_v34 = vrot.slane %v2135_v29, %v1567_v11  ;;  %v591_v63 = vld [vmem:[#allocation2 + $0x78] sm:$0xff]  ;;  %v2012_v60 = vmul.f32 %v984_v27, %v2137_v0 }
  0xe0   :  { %1234 = vmatprep.subr.mxu0 %v591_v63 }
  0xe1   :  { %v396_v38 = vmul.f32 %v395_v30, %v380_v61  ;;  %v402_v39 = vmul.f32 %v401_v33, %v380_v61  ;;  %v408_v41 = vmul.f32 %v407_v14, %v380_v61  ;;  %v723_v10 = vsel %vm717_vm11, %v722_v34, 0.0  ;;  %1235 = vmatpush3.msra.mxu0 %v591_v63  ;;  %v590_v61 = vld [vmem:[#allocation2 + $0x70] sm:$0xff]  ;;  %v579_v34 = vld [vmem:[#allocation2 + $0x18] sm:$0xff] }
  0xe2   :  { %v1940_v22 = vadd.f32 %v733_v44, %v723_v10  ;;  %v773_v33 = vsub.s32 6, %v1558_v8  ;;  %v1486_v14 = vmov 0.0   ;;  %1236 = vmatprep.subr.mxu0 %v590_v61  ;;  %v577_v10 = vld [vmem:[#allocation2 + $0x8] sm:$0xff] }
  0xe3   :  { %v409_v3 = vmul.f32 %v396_v38, %v1727_v18  ;;  %v410_v42 = vmul.f32 %v402_v39, %v1733_v31  ;;  %v415_v55 = vmul.f32 %v396_v38, %v1795_v2  ;;  %v416_v13 = vmul.f32 %v402_v39, %v1822_v50  ;;  %1269 = vmatprep.subr.mxu1 %v1486_v14 }
  0xe4   :  { %v412_v7 = vmul.f32 %v408_v41, %v1725_v6  ;;  %v418_v15 = vmul.f32 %v408_v41, %v1742_v37  ;;  %v780_v54 = vrot.slane %v1940_v22, %v779_v40  ;;  %v774_v39 = vrot.slane %v1940_v22, %v773_v33  ;;  %1237 = vmatpush3.msra.mxu0 %v590_v61  ;;  %v589_v41 = vld [vmem:[#allocation2 + $0x68] sm:$0xff] }
  0xe5   :  { %v411_v19 = vadd.f32 %v410_v42, %v409_v3  ;;  %v417_v56 = vadd.f32 %v416_v13, %v415_v55  ;;  %v767_v42 = vsub.s32 5, %v1558_v8  ;;  %1238 = vmatprep.subr.mxu0 %v589_v41  ;;  %v588_v55 = vld [vmem:[#allocation2 + $0x60] sm:$0xff]  ;;  %v744_v29 = vrot.slane %v1940_v22, %v1624_v46  ;;  %1301 = vmatprep.mubr.msk.f32.mxu1 %vm1487_vm1, %v1486_v14 }
  0xe6   :  { %v782_v30 = vmul.f32 %v780_v54, %v1942_v52  ;;  %v781_v38 = vmul.f32 %v780_v54, %v1945_v1  ;;  %v776_v3 = vmul.f32 %v774_v39, %v1942_v52  ;;  %1239 = vmatpush3.msra.mxu0 %v589_v41  ;;  %v775_v13 = vmul.f32 %v774_v39, %v1945_v1 }
  0xe7   :  { %v413_v4 = vadd.f32 %v412_v7, %v411_v19  ;;  %v419_v51 = vadd.f32 %v418_v15, %v417_v56  ;;  %v768_v19 = vrot.slane %v1940_v22, %v767_v42  ;;  %1240 = vmatprep.subr.mxu0 %v588_v55  ;;  %v587_v7 = vld [vmem:[#allocation2 + $0x58] sm:$0xff]  ;;  %v761_v15 = vsub.s32 4, %v1558_v8 }
  0xe8   :  { %1270 = vmatpush3.msra.mxu1 %v782_v30  ;;  %1241 = vmatpush3.msra.mxu0 %v588_v55  ;;  %v738_v26 = vrot.slane %v1940_v22, %v1567_v11  ;;  %v746_v45 = vmul.f32 %v744_v29, %v1942_v52  ;;  %v745_v58 = vmul.f32 %v744_v29, %v1945_v1 }
  0xe9   :  { %v1884_v16 = vadd.f32 %v413_v4, %v1843_v25  ;;  %v1887_v28 = vadd.f32 %v419_v51, %v1851_v12  ;;  %1271 = vmatprep.subr.mxu1 %v1486_v14  ;;  %v770_v56 = vmul.f32 %v768_v19, %v1942_v52  ;;  %1242 = vmatprep.subr.mxu0 %v587_v7  ;;  %v586_v4 = vld [vmem:[#allocation2 + $0x50] sm:$0xff] }
  0xea   :  { %1272 = vmatpush3.msra.mxu1 %v781_v38  ;;  %1243 = vmatpush3.msra.mxu0 %v587_v7  ;;  %v769_v51 = vmul.f32 %v768_v19, %v1945_v1  ;;  %v740_v44 = vmul.f32 %v738_v26, %v1942_v52  ;;  %v972_v54 = vrot.slane %v1693_v20, %v767_v42 }
  0xeb   :  { %v427_v18 = vand.u32 2147483647, %v1884_v16  ;;  %v453_v31 = vrot.slane %v1887_v28, 6  ;;  %v436_v49 = vand.u32 2147483647, %v1887_v28  ;;  %1273 = vmatprep.subr.mxu1 %v1486_v14  ;;  %1244 = vmatprep.subr.mxu0 %v586_v4  ;;  %v948_v19 = vrot.slane %v1693_v20, %v1624_v46 }
  0xec   :  { %1274 = vmatpush3.msra.mxu1 %v776_v3  ;;  %1245 = vmatpush3.msra.mxu0 %v586_v4  ;;  %v974_v63 = vmul.f32 %v972_v54, %v1677_v9  ;;  %v973_v30 = vmul.f32 %v972_v54, %v2137_v0 }
  0xed   :  { %v428_v2 = vsel %vm423_vm8, %v427_v18, 0.0  ;;  %v1894_v6 = vsel %vm423_vm8, %v1884_v16, %v453_v31  ;;  %v437_v36 = vsel %vm423_vm8, %v436_v49, 0.0  ;;  %1275 = vmatprep.subr.mxu1 %v1486_v14  ;;  %v762_v18 = vrot.slane %v1940_v22, %v761_v15  ;;  %v585_v31 = vld [vmem:[#allocation2 + $0x48] sm:$0xff] }
  0xee   :  { %429 = vadd.xlane.f32.xlu1 %v428_v2  ;;  %v457_v37 = vrot.slane %v1894_v6, 1  ;;  %1276 = vmatpush3.msra.mxu1 %v775_v13  ;;  %v749_v49 = vsub.s32 2, %v1558_v8  ;;  %v2048_v7 = vmul.f32 %v948_v19, %v1677_v9 }
  0xef   :  { %1277 = vmatprep.subr.mxu1 %v1486_v14  ;;  %v764_v2 = vmul.f32 %v762_v18, %v1942_v52  ;;  %1246 = vmatprep.subr.mxu0 %v585_v31 }
  0xf0   :  { %v459_v50 = vadd.f32 %v457_v37, %v1894_v6  ;;  %1278 = vmatpush3.msra.mxu1 %v770_v56  ;;  %1247 = vmatpush3.msra.mxu0 %v585_v31  ;;  %v954_v42 = vrot.slane %v1693_v20, %v749_v49  ;;  %v2051_v56 = vmul.f32 %v948_v19, %v2137_v0 }
  0xf1   :  { %1279 = vmatprep.subr.mxu1 %v1486_v14 }
  0xf2   :  { %v460_v25 = vmul.f32 0.5, %v459_v50  ;;  %1280 = vmatpush3.msra.mxu1 %v769_v51  ;;  %v584_v50 = vld [vmem:[#allocation2 + $0x40] sm:$0xff]  ;;  %v956_v55 = vmul.f32 %v954_v42, %v1677_v9  ;;  %v2043_v13 = vmul.f32 %v954_v42, %v2137_v0 }
  0xf3   :  { %1281 = vmatprep.subr.mxu1 %v1486_v14  ;;  %1248 = vmatprep.subr.mxu0 %v584_v50 }
  0xf4   :  { %v462_v12 = vsel %vm461_vm9, %v1894_v6, %v460_v25  ;;  %v465_v5 = vrot.slane %v460_v25, 7  ;;  %1282 = vmatpush3.msra.mxu1 %v764_v2  ;;  %v763_v25 = vmul.f32 %v762_v18, %v1945_v1  ;;  %1249 = vmatpush3.msra.mxu0 %v584_v50 }
  0xf5   :  { %v1901_v21 = vsel %vm423_vm8, %v462_v12, %v457_v37  ;;  %v755_v37 = vsub.s32 3, %v1558_v8  ;;  %1283 = vmatprep.subr.mxu1 %v1486_v14 }
  0xf6   :  { %v503_v43 = vsel %vm468_vm10, %v1901_v21, 0.0  ;;  %v467_v24 = vsel %vm423_vm8, %v462_v12, %v465_v5  ;;  %v476_v59 = vand.u32 2147483647, %v1901_v21  ;;  %1284 = vmatpush3.msra.mxu1 %v763_v25  ;;  %v583_v5 = vld [vmem:[#allocation2 + $0x38] sm:$0xff] }
  0xf7   :  { %504 = vadd.xlane.f32.xlu0 %v503_v43  ;;  %v1909_v47 = vsel %vm468_vm10, %v467_v24, %v1894_v6  ;;  %v756_v12 = vrot.slane %v1940_v22, %v755_v37  ;;  %1250 = vmatprep.subr.mxu0 %v583_v5  ;;  %v582_v24 = vld [vmem:[#allocation2 + $0x30] sm:$0xff]  ;;  %v960_v39 = vrot.slane %v1693_v20, %v755_v37 }
  0xf8   :  { %v470_v23 = vsub.f32 %v1909_v47, %v1894_v6  ;;  %v477_v32 = vsel %vm468_vm10, %v476_v59, 0.0  ;;  %1285 = vmatprep.subr.mxu1 %v1486_v14  ;;  %1251 = vmatpush3.msra.mxu0 %v583_v5  ;;  %v750_v59 = vrot.slane %v1940_v22, %v749_v49  ;;  %v739_v22 = vmul.f32 %v738_v26, %v1945_v1  ;;  %v2139_v49 = vld [vmem:[#allocation17_spill] sm:$0xff] }
  0xf9   :  { %v758_v43 = vmul.f32 %v756_v12, %v1942_v52  ;;  %1252 = vmatprep.subr.mxu0 %v582_v24  ;;  %v962_v41 = vmul.f32 %v960_v39, %v1677_v9  ;;  %v961_v3 = vmul.f32 %v960_v39, %v2137_v0  ;;  %v431_v6 = vsub.f32 0.0, %v1887_v28 }
  0xfa   :  { %1253 = vmatpush3.msra.mxu0 %v582_v24  ;;  %v752_v62 = vmul.f32 %v750_v59, %v1942_v52  ;;  %v978_v52 = vrot.slane %v1693_v20, %v773_v33  ;;  %v966_v33 = vrot.slane %v1693_v20, %v761_v15  ;;  %v942_v15 = vrot.slane %v1693_v20, %v1567_v11 }
  0xfb   :  { %438 = vadd.xlane.f32.xlu0 %v437_v36  ;;  %1286 = vmatpush3.msra.mxu1 %v758_v43  ;;  %v757_v36 = vmul.f32 %v756_v12, %v1945_v1  ;;  %v558_v24 = vrot.slane %v2139_v49, %v1567_v11 }
  0xfc   :  { %1287 = vmatprep.subr.mxu1 %v1486_v14  ;;  %1254 = vmatprep.subr.mxu0 %v581_v17  ;;  %v980_v40 = vmul.f32 %v978_v52, %v1677_v9  ;;  %v968_v61 = vmul.f32 %v966_v33, %v1677_v9  ;;  %v967_v38 = vmul.f32 %v966_v33, %v2137_v0  ;;  %v421_v33 = vsub.f32 0.0, %v1884_v16 }
  0xfd   :  { %1288 = vmatpush3.msra.mxu1 %v757_v36  ;;  %1255 = vmatpush3.msra.mxu0 %v581_v17  ;;  %v2056_v8 = vmul.f32 %v942_v15, %v1677_v9  ;;  %v2059_v4 = vmul.f32 %v942_v15, %v2137_v0  ;;  %v2138_v9 = vld [vmem:[#allocation16_spill] sm:$0xff] }
  0xfe   :  { %1289 = vmatprep.subr.mxu1 %v1486_v14  ;;  %1256 = vmatprep.subr.mxu0 %v580_v35  ;;  %v553_v43 = vrot.slane %v2138_v9, %v1567_v11  ;;  %v422_v39 = vmax.f32 %v421_v33, 0.0 }
  0xff   :  { %478 = vadd.xlane.f32.xlu0 %v477_v32  ;;  %v751_v32 = vmul.f32 %v750_v59, %v1945_v1  ;;  %1290 = vmatpush3.msra.mxu1 %v752_v62  ;;  %v979_v1 = vmul.f32 %v978_v52, %v2137_v0 }
 0x100   :  { %1291 = vmatprep.subr.mxu1 %v1486_v14  ;;  %1257 = vmatpush3.msra.mxu0 %v580_v35 }
 0x101   :  { %1292 = vmatpush3.msra.mxu1 %v751_v32  ;;  %1258 = vmatprep.subr.mxu0 %v579_v34 }
 0x102   :  { %1293 = vmatprep.subr.mxu1 %v1486_v14  ;;  %1259 = vmatpush3.msra.mxu0 %v579_v34 }
 0x103   :  { %1294 = vmatpush3.msra.mxu1 %v746_v45  ;;  %1260 = vmatprep.subr.mxu0 %v578_v48 }
 0x104   :  { %1295 = vmatprep.subr.mxu1 %v1486_v14  ;;  %1261 = vmatpush3.msra.mxu0 %v578_v48 }
 0x105   :  { %1296 = vmatpush3.msra.mxu1 %v745_v58  ;;  %1262 = vmatprep.subr.mxu0 %v577_v10 }
 0x106   :  { %1297 = vmatprep.subr.mxu1 %v1486_v14  ;;  %1263 = vmatpush3.msra.mxu0 %v577_v10 }
 0x107   :  { %1298 = vmatpush3.msra.mxu1 %v740_v44  ;;  %1264 = vmatprep.subr.mxu0 %v576_v57 }
 0x108   :  { %1299 = vmatprep.subr.mxu1 %v1486_v14  ;;  %1265 = vmatpush3.msra.mxu0 %v576_v57 }
 0x109   :  { %1300 = vmatpush3.msra.mxu1 %v739_v22  ;;  %1304 = vmatprep.subr.mxu0 %v1486_v14 }
 0x180   :  { %v505_v51 = vpop.xlane.xlu0 %504 }
 0x181   :  { %v506_v18 = vsel %vm468_vm10, %v505_v51, 0.0 }
 0x182   :  { %v507_v31 = vrot.slane %v506_v18, 4 }
 0x184   :  { %v508_v46 = vadd.f32 %v507_v31, %v506_v18 }
 0x186   :  { %v509_v2 = vrot.slane %v508_v46, 2 }
 0x188   :  { %v510_v37 = vadd.f32 %v509_v2, %v508_v46 }
 0x18a   :  { %v511_v50 = vrot.slane %v510_v37, 1 }
 0x18c   :  { %v512_v25 = vadd.f32 %v511_v50, %v510_v37  ;;  %v432_v37 = vmax.f32 %v431_v6, 0.0 }
 0x18e   :  { %1365 = vrcp.f32 %v512_v25  ;;  %v433_v50 = vsel %vm423_vm8, %v432_v37, 0.0 }
 0x19b   :  { %v1366_v12 = vpop.eup %1365 }
 0x19c   :  { %v514_v5 = vmul.f32 384.0, %v1366_v12 }
 0x19e   :  { %v515_v20 = vmul.f32 %v514_v5, %v1901_v21 }
 0x1a0   :  { %560 = vst [vmem:[#allocation8] sm:$0x7] %v515_v20  ;;  %v554_v36 = vmul.f32 %v553_v43, %v515_v20  ;;  %v559_v59 = vmul.f32 %v558_v24, %v515_v20  ;;  %v565_v27 = vrot.slane %v515_v20, 2  ;;  %v786_v29 = vrot.slane %v515_v20, 7 }
 0x1a2   :  { %v562_v17 = vrot.slane %v559_v59, 5  ;;  %v987_v62 = vrot.slane %v554_v36, 2  ;;  %571 = vst [vmem:[#allocation10 + $0x8] sm:$0x1] %v565_v27  ;;  %v784_v35 = vrot.slane %v554_v36, 1  ;;  %v989_v32 = vrot.slane %v559_v59, 1 }
 0x1a4   :  { %v567_v34 = vsel %vm468_vm10, %v554_v36, %v562_v17  ;;  %v788_v21 = vsel %vm461_vm9, %v784_v35, %v559_v59  ;;  %v991_v26 = vsel %vm461_vm9, %v987_v62, %v989_v32 }
 0x1a5   :  { %v569_v45 = vsel %vm568_vm2, %v567_v34, %v565_v27  ;;  %v789_v11 = vsel %vm423_vm8, %v788_v21, %v786_v29  ;;  %v992_v48 = vsel %vm423_vm8, %v991_v26, %v515_v20 }
 0x1a6   :  { %570 = vst [vmem:[#allocation10] sm:$0xff] %v569_v45  ;;  %1266 = vmatprep.mubr.f32.mxu0 %v569_v45  ;;  %1302 = vmatmul.mubr.msk.f32.vlgmr.msra.gmra.mxu1 %vm468_vm10, %v789_v11 }
 0x1a7   :  { %1267 = vmatmul.mubr.msk.f32.vlgmr.msra.gmra.mxu0 %vm461_vm9, %v565_v27 }
 0x1a8   :  { %1305 = vmatpush3.msra.mxu0 %v2007_v53  ;;  %1336 = vmatprep.mubr.msk.f32.mxu0 %vm1487_vm1, %v1486_v14 }
 0x1a9   :  { %1306 = vmatprep.subr.mxu0 %v1486_v14 }
 0x1aa   :  { %1307 = vmatpush3.msra.mxu0 %v2012_v60 }
 0x1ab   :  { %1308 = vmatprep.subr.mxu0 %v1486_v14 }
 0x1ac   :  { %1309 = vmatpush3.msra.mxu0 %v980_v40 }
 0x1ad   :  { %1310 = vmatprep.subr.mxu0 %v1486_v14 }
 0x1ae   :  { %1311 = vmatpush3.msra.mxu0 %v979_v1 }
 0x1af   :  { %1312 = vmatprep.subr.mxu0 %v1486_v14 }
 0x1b0   :  { %1313 = vmatpush3.msra.mxu0 %v974_v63 }
 0x1b1   :  { %1314 = vmatprep.subr.mxu0 %v1486_v14 }
 0x1b2   :  { %1315 = vmatpush3.msra.mxu0 %v973_v30 }
 0x1b3   :  { %1316 = vmatprep.subr.mxu0 %v1486_v14 }
 0x1b4   :  { %1317 = vmatpush3.msra.mxu0 %v968_v61 }
 0x1b5   :  { %1318 = vmatprep.subr.mxu0 %v1486_v14 }
 0x1b6   :  { %1319 = vmatpush3.msra.mxu0 %v967_v38 }
 0x1b7   :  { %1320 = vmatprep.subr.mxu0 %v1486_v14 }
 0x1b8   :  { %1321 = vmatpush3.msra.mxu0 %v962_v41  ;;  %v424_v41 = vsel %vm423_vm8, %v422_v39, 0.0 }
 0x1b9   :  { %1322 = vmatprep.subr.mxu0 %v1486_v14 }
 0x1ba   :  { %1323 = vmatpush3.msra.mxu0 %v961_v3  ;;  %v471_v3 = vand.u32 2147483647, %v470_v23 }
 0x1bb   :  { %1324 = vmatprep.subr.mxu0 %v1486_v14 }
 0x1bc   :  { %1325 = vmatpush3.msra.mxu0 %v956_v55  ;;  %v473_v42 = vsel %vm472_vm3, %v471_v3, 0.0 }
 0x1bd   :  { %1326 = vmatprep.subr.mxu0 %v1486_v14 }
 0x1be   :  { %1327 = vmatpush3.msra.mxu0 %v2043_v13 }
 0x1bf   :  { %1328 = vmatprep.subr.mxu0 %v1486_v14 }
 0x1c0   :  { %1329 = vmatpush3.msra.mxu0 %v2048_v7 }
 0x1c1   :  { %1330 = vmatprep.subr.mxu0 %v1486_v14 }
 0x1c2   :  { %1331 = vmatpush3.msra.mxu0 %v2051_v56 }
 0x1c3   :  { %1332 = vmatprep.subr.mxu0 %v1486_v14 }
 0x1c4   :  { %1333 = vmatpush3.msra.mxu0 %v2056_v8 }
 0x1c5   :  { %1334 = vmatprep.subr.mxu0 %v1486_v14 }
 0x1c6   :  { %1335 = vmatpush3.msra.mxu0 %v2059_v4 }
 0x1c7   :  { %1337 = vmatmul.mubr.msk.f32.vlgmr.msra.gmra.mxu0 %vm468_vm10, %v992_v48 }
 0x266   :  { %v857_v58 = vpop.f32.mrf.mxu1 }
 0x267   :  { %v1268_v10 = vpop.f32.mrf.mxu0 }
 0x268   :  { %v1303_v44 = vpop.f32.mrf.mxu1 }
 0x269   :  { %v658_v53 = vpop.f32.mrf.mxu0 }
 0x26a   :  { %v863_v57 = vrot.slane %v658_v53, 2  ;;  %v866_v22 = vrot.slane %v658_v53, 4  ;;  %v861_v0 = vsub.f32 %v857_v58, %v658_v53  ;;  %v1064_v55 = vrot.slane %v658_v53, 1 }
 0x26b   :  { %v1067_v13 = vrot.slane %v658_v53, 3  ;;  %v1070_v19 = vrot.slane %v658_v53, 5 }
 0x26c   :  { %v865_v60 = vsub.f32 %v857_v58, %v863_v57  ;;  %v868_v52 = vsub.f32 %v857_v58, %v866_v22  ;;  %v869_v54 = vmul.f32 %v861_v0, %v861_v0 }
 0x26e   :  { %v870_v40 = vmul.f32 %v865_v60, %v865_v60  ;;  %v875_v1 = vmul.f32 %v868_v52, %v868_v52 }
 0x270   :  { %v872_v63 = vrot.slane %v870_v40, 1  ;;  %v877_v30 = vrot.slane %v875_v1, 2 }
 0x272   :  { %v874_v14 = vadd.f32 %v872_v63, %v869_v54 }
 0x274   :  { %v879_v61 = vadd.f32 %v877_v30, %v874_v14 }
 0x276   :  { %v880_v38 = vsel %vm461_vm9, %v879_v61, 0.0 }
 0x277   :  { %881 = vadd.xlane.f32.xlu1 %v880_v38 }
 0x27b   :  { %425 = vadd.xlane.f32.xlu1 %v424_v41 }
 0x27f   :  { %474 = vadd.xlane.f32.xlu1 %v473_v42 }
 0x287   :  { %v1060_v7 = vpop.f32.mrf.mxu0 }
 0x288   :  { %v1066_v16 = vsub.f32 %v1060_v7, %v1064_v55  ;;  %v1069_v56 = vsub.f32 %v1060_v7, %v1067_v13  ;;  %v1072_v15 = vsub.f32 %v1060_v7, %v1070_v19 }
 0x289   :  { %v1338_v8 = vpop.f32.mrf.mxu0 }
 0x28a   :  { %v1074_v4 = vmul.f32 %v1069_v56, %v1069_v56  ;;  %v1079_v51 = vmul.f32 %v1072_v15, %v1072_v15  ;;  %v1073_v18 = vmul.f32 %v1066_v16, %v1066_v16 }
 0x28c   :  { %v1076_v31 = vrot.slane %v1074_v4, 1  ;;  %v1081_v2 = vrot.slane %v1079_v51, 2 }
 0x28e   :  { %v1078_v46 = vadd.f32 %v1076_v31, %v1073_v18 }
 0x290   :  { %v1083_v47 = vadd.f32 %v1081_v2, %v1078_v46 }
 0x292   :  { %v1084_v23 = vsel %vm461_vm9, %v1083_v47, 0.0 }
 0x293   :  { %1085 = vadd.xlane.f32.xlu0 %v1084_v23 }
 0x297   :  { %434 = vadd.xlane.f32.xlu0 %v433_v50 }
 0x298   :  { %1424 = shalt.err (!%p1421_p0)
}
 0x299   :  { %1120 = dma.vmem_to_hbm [thread:$0]  %s1118_s29, 64, %s2127_s6, [#allocation9]  }
 0x29a   :  { %s1489_s4 = smov [#allocation10]  }
 0x29b   :  { %s1126_s12 = sshll.u32 %s1489_s4, 4  ;;  %s1127_s12 = int_to_ptr.vmem [resolvable:$true] %s1126_s12 }
 0x29c   :  { %s1433_s13 = scalar_lea.vmem %s1127_s12, 256  ;;  %p1438_p2 = scmp.lt.s32.totalorder %s1127_s12, %s1127_s12 }
 0x29d   :  { %p1434_p1 = scmp.ne.s32.totalorder %s1127_s12, %s1433_s13  ;;  %p1439_p3 = scmp.lt.s32.totalorder %s1433_s13, %s1433_s13 }
 0x29f   :  { %p1440_p4 = por %p1439_p3, %p1438_p2 }
 0x2a1   :  { %p1441_p5 = pnand %p1440_p4, %p1434_p1 }
 0x2a3   :  { %1444 = shalt.err (!%p1441_p5)
}
 0x2a4   :  { %1132 = dma.vmem_to_hbm [thread:$0]  %s1127_s12, 256, %s2128_s7, [#allocation9], %s1482_s30, %s1482_s30, %s1483_s8   ;;  %v439_v28 = vpop.xlane.xlu0 %438  ;;  %v430_v25 = vpop.xlane.xlu1 %429 }
 0x2a5   :  { %1367 = vrcp.f32 %v430_v25  ;;  %s1490_s6 = smov [#allocation7]  }
 0x2a6   :  { %1369 = vrcp.f32 %v439_v28  ;;  %s1107_s7 = sshll.u32 %s1490_s6, 4  ;;  %s1108_s7 = int_to_ptr.vmem [resolvable:$true] %s1107_s7 }
 0x2a7   :  { %s1453_s30 = scalar_lea.vmem %s1108_s7, 16  ;;  %s1457_s8 = scalar_lea.vmem %s1108_s7, 32 }
 0x2a8   :  { %v479_v5 = vpop.xlane.xlu0 %478  ;;  %p1454_p6 = scmp.ne.s32.totalorder %s1108_s7, %s1453_s30  ;;  %p1458_p7 = scmp.lt.s32.totalorder %s1108_s7, %s1108_s7 }
 0x2a9   :  { %v487_v20 = vmul.f32 4.0, %v479_v5  ;;  %v495_v49 = vrot.slane %v479_v5, 7  ;;  %p1459_p8 = scmp.lt.s32.totalorder %s1457_s8, %s1453_s30 }
 0x2ab   :  { %1371 = vrcp.f32 %v487_v20  ;;  %p1460_p9 = por %p1459_p8, %p1458_p7 }
 0x2ad   :  { %p1461_p10 = pnand %p1460_p9, %p1454_p6 }
 0x2b2   :  { %v1368_v27 = vpop.eup %1367 }
 0x2b3   :  { %v1370_v62 = vpop.eup %1369 }
 0x2b8   :  { %v1372_v26 = vpop.eup %1371 }
 0x300   :  { %v882_v12 = vpop.xlane.xlu1 %881 }
 0x301   :  { %v883_v9 = vmul.f32 0.0026041667, %v882_v12 }
 0x303   :  { %1373 = vrsqrt.f32 %v883_v9  ;;  %vm886_vm4 = vcmp.eq.f32.partialorder %v883_v9, inf  ;;  %v889_v30 = vand.u32 2147483648, %v883_v9  ;;  %vm888_vm6 = vcmp.eq.f32.partialorder %v883_v9, 0.0 }
 0x304   :  { %v426_v43 = vpop.xlane.xlu1 %425  ;;  %1375 = vrcp.f32 %v479_v5 }
 0x305   :  { %1377 = vrcp.f32 %v495_v49  ;;  %v441_v32 = vmul.f32 %v1368_v27, %v426_v43 }
 0x308   :  { %v475_v24 = vpop.xlane.xlu1 %474 }
 0x309   :  { %v484_v17 = vrot.slane %v475_v24, 1 }
 0x30b   :  { %v486_v34 = vadd.f32 %v484_v17, %v475_v24 }
 0x30d   :  { %v489_v58 = vmul.f32 %v1372_v26, %v486_v34 }
 0x30f   :  { %v491_v0 = vrot.slane %v489_v58, 1 }
 0x310   :  { %v1374_v11 = vpop.eup %1373 }
 0x311   :  { %v885_v44 = vmul.f32 %v1374_v11, %v883_v9  ;;  %v1376_v53 = vpop.eup %1375 }
 0x312   :  { %v1378_v22 = vpop.eup %1377  ;;  %v481_v40 = vmul.f32 %v1376_v53, %v475_v24 }
 0x313   :  { %v498_v1 = vmul.f32 %v1378_v22, %v475_v24  ;;  %v887_v54 = vsel %vm886_vm4, %v883_v9, %v885_v44 }
 0x314   :  { %v493_v61 = vadd.f32 %v491_v0, %v481_v40  ;;  %v890_v41 = vsel %vm888_vm6, %v889_v30, %v887_v54 }
 0x315   :  { %v500_v42 = vrot.slane %v498_v1, 3 }
 0x317   :  { %v502_v13 = vadd.f32 %v500_v42, %v493_v61 }
 0x31c   :  { %v1086_v36 = vpop.xlane.xlu0 %1085 }
 0x31d   :  { %v1087_v59 = vmul.f32 0.0026041667, %v1086_v36 }
 0x31f   :  { %1379 = vrsqrt.f32 %v1087_v59  ;;  %vm1090_vm5 = vcmp.eq.f32.partialorder %v1087_v59, inf  ;;  %v1093_v33 = vand.u32 2147483648, %v1087_v59  ;;  %vm1092_vm7 = vcmp.eq.f32.partialorder %v1087_v59, 0.0 }
 0x320   :  { %v435_v35 = vpop.xlane.xlu0 %434 }
 0x321   :  { %v443_v29 = vmul.f32 %v1370_v62, %v435_v35 }
 0x323   :  { %v444_v21 = vadd.f32 %v443_v29, %v441_v32 }
 0x325   :  { %v445_v45 = vsel %vm423_vm8, %v444_v21, 0.0  ;;  %vm1099_vm8 = vcmask 0  }
 0x326   :  { %v446_v48 = vrot.slane %v445_v45, 4 }
 0x328   :  { %v447_v10 = vadd.f32 %v446_v48, %v445_v45 }
 0x32a   :  { %v448_v57 = vrot.slane %v447_v10, 2 }
 0x32c   :  { %v1380_v60 = vpop.eup %1379  ;;  %v449_v52 = vadd.f32 %v448_v57, %v447_v10 }
 0x32d   :  { %v1089_v63 = vmul.f32 %v1380_v60, %v1087_v59 }
 0x32e   :  { %v450_v14 = vrot.slane %v449_v52, 1 }
 0x32f   :  { %v1091_v38 = vsel %vm1090_vm5, %v1087_v59, %v1089_v63 }
 0x330   :  { %v451_v39 = vadd.f32 %v450_v14, %v449_v52  ;;  %v1094_v3 = vsel %vm1092_vm7, %v1093_v33, %v1091_v38 }
 0x331   :  { %v1095_v55 = vadd.f32 %v1094_v3, %v890_v41 }
 0x333   :  { %v1096_v19 = vadd.f32 %v1095_v55, %v451_v39 }
 0x335   :  { %v1097_v7 = vadd.f32 %v1096_v19, %v502_v13 }
 0x337   :  { %v1098_v16 = vmul.f32 0.5, %v1097_v7 }
 0x339   :  { %1100 = vst.msk [vmem:[#allocation7] sm:$0x1] %vm1099_vm8, %v1098_v16 }
 0x33a   :  { %1464 = shalt.err (!%p1461_p10)
}
 0x33b   :  { %1110 = dma.vmem_to_hbm [thread:$0]  %s1108_s7, 16, %s2126_s5, [#allocation4]  }
 0x33c   :  { %1477 = dma.done.wait [#allocation4], 16  }
 0x33d   :  { %1478 = vsyncadd [#allocation4], 4294967280 }
 0x33e   :  { %1479 = dma.done.wait [#allocation9], 320  }
 0x33f   :  { %1480 = vsyncadd [#allocation9], 4294966976 }
 0x340   :  { %1142 = vsyncpa [#allocation3], 1 }
 0x341   :  { %1143 = vsyncpa [#allocation4], 1 }
 0x342   :  { %1144 = vsyncpa [#allocation9], 1 }
 0x343   :  { %1145 = vsyncpa [#allocation5], 1 }

</bundles_post_ra>
